<compile_context>
chip_gen: v7x
topology: tpu7x:2x2x1
jax: 0.10.0
libtpu: 0.0.40
codegen_flags: <defaults>
</compile_context>

<pallas_src>
import functools

import jax
import jax.numpy as jnp
from jax.experimental import pallas as pl
from jax.experimental.pallas import tpu as pltpu


def _round_up(n, m):
    return (n + m - 1) // m * m


def _pad2(x, rows, cols):
    return jnp.pad(x, ((0, rows - x.shape[0]), (0, cols - x.shape[1])))


def _preferred_lane(hidden_size):
    """Out-feature (N) tile width. v6e/v7x MXUs are 2x256^2 -> 256-wide weight
    tiles for wide layers; v5e's MXU is 4x128^2 -> 128 is already native.
    Only use 256 when hidden is a multiple of 256, otherwise the extra zero
    padding wastes VMEM/MXU instead of helping."""
    if hidden_size % 256 != 0:
        return 128
    try:
        kind = jax.devices()[0].device_kind.lower()
    except Exception:
        return 128
    if "v5e" in kind or "v5 lite" in kind or "v5litepod" in kind:
        return 128
    return 256


# ---------------------------------------------------------------------------
# Kernel
# ---------------------------------------------------------------------------
def _mlp_kernel(num_layers, apply_tanh, scale, factor, *refs):
    """Fused forward pass for one batch tile.

    refs = (x_ref,
            [W_i, BA_i] * num_layers,   # W_i: (in, H) bf16; BA_i: (2, H) f32 (bias, slope)
            W_out, b_out,
            out_ref)
    Weights are pre-transposed (in_features, out_features) so y = x @ W + b.
    """
    x_ref = refs[0]
    out_ref = refs[-1]
    params = refs[1:-1]

    h = x_ref[...]  # bf16 activations, MXU-native
    idx = 0
    for _ in range(num_layers):
        w = params[idx][...]            # (in, H) bf16
        ba = params[idx + 1][...]       # (2, H) f32
        idx += 2
        b = ba[0:1, :]                  # (1, H) f32, broadcasts over batch tile
        a = ba[1:2, :]                  # (1, H) f32 PReLU slopes
        z = jnp.dot(h, w, preferred_element_type=jnp.float32) + b
        # PReLU in f32 (post-accumulate), cast back to bf16 for next MXU pass.
        h = jnp.where(z > 0, z, a * z).astype(h.dtype)

    w_out = params[idx][...]
    b_out = params[idx + 1][...]        # (1, out) f32
    y = jnp.dot(h, w_out, preferred_element_type=jnp.float32) + b_out
    if apply_tanh:
        y = scale * jnp.tanh(factor * y)  # EUP op, essentially free under MXU work
    out_ref[...] = y.astype(out_ref.dtype)


# ---------------------------------------------------------------------------
# Packing + wrapper
# ---------------------------------------------------------------------------
def pack_params(params, param_dtype=jnp.bfloat16, lane=None):
    """Pad out-feature dims to lane multiples, cast weights to `param_dtype`,
    and pack each layer's (bias, PReLU slope) into one (2, H) f32 array.

    The first layer's K dim is NOT padded (x is not feature-padded), every
    other K dim is padded to match the previous layer's padded width.  Zero
    padding preserves semantics exactly (PReLU(0)=0, tanh(0)=0 propagate).
    """
    num_layers = (len(params) - 2) // 3
    if lane is None:
        lane = _preferred_lane(params[0].shape[1])
    packed = []
    idx = 0
    for layer in range(num_layers):
        w, b, a = params[idx], params[idx + 1], params[idx + 2]
        idx += 3
        kin, kout = w.shape
        kin_p = kin if layer == 0 else _round_up(kin, lane)
        kout_p = _round_up(kout, lane)
        packed.append(_pad2(w, kin_p, kout_p).astype(param_dtype))
        ba = jnp.concatenate(
            [_pad2(b.reshape(1, -1), 1, kout_p),
             _pad2(a.reshape(1, -1), 1, kout_p)], axis=0).astype(jnp.float32)
        packed.append(ba)
    w, b = params[idx], params[idx + 1]
    kin, kout = w.shape
    kin_p = kin if num_layers == 0 else _round_up(kin, lane)
    kout_p = _round_up(kout, 128)       # 128 output lanes -> unmasked vst
    packed.append(_pad2(w, kin_p, kout_p).astype(param_dtype))
    packed.append(_pad2(b.reshape(1, -1), 1, kout_p).astype(jnp.float32))
    return packed


def _choose_bm(batch, block_m):
    """Largest batch tile <= block_m that is a multiple of 8 sublanes, keeps
    the parallel grid length >= 2 when the batch permits (v7x has 2 TCs), and
    divides the batch exactly when possible (avoids a wrapper-side pad of x)."""
    bm_cap = min(block_m, _round_up(batch, 8))
    if batch >= 16:
        bm_cap = min(bm_cap, _round_up(-(-batch // 2), 8))  # grid length >= 2
    bm_cap = max(8, bm_cap - bm_cap % 8)
    for bm in range(bm_cap, 7, -8):
        if batch % bm == 0:
            return bm
    return bm_cap


def sequential_multilayer_nn(x, packed_params, output_size, *, block_m=512,
                             apply_scaled_tanh=False, scale=1.0, factor=0.1,
                             out_dtype=None):
    """Batch-tiled, weight-stationary fused MLP forward.

    x: (batch, input_size) bf16/f32 (NOT feature-padded).
    packed_params: output of pack_params.
    """
    batch, in_features = x.shape
    assert packed_params[0].shape[0] == in_features, "x feature dim mismatch"
    out_pad = packed_params[-1].shape[1]
    num_layers = (len(packed_params) - 2) // 2
    out_dtype = x.dtype if out_dtype is None else out_dtype

    bm = _choose_bm(batch, block_m)
    batch_pad = _round_up(batch, bm)
    x_p = x if batch_pad == batch else jnp.pad(x, ((0, batch_pad - batch), (0, 0)))
    grid = (batch_pad // bm,)

    # VMEM budget: resident params (single-buffered) + double-buffered x/out
    # blocks + f32 activation temporaries, with generous headroom.
    param_bytes = sum(int(p.size) * p.dtype.itemsize for p in packed_params)
    hid_max = max(int(p.shape[1]) for p in packed_params[::2])
    act_bytes = bm * hid_max * 4 * 4
    io_bytes = 2 * (bm * in_features * x_p.dtype.itemsize
                    + bm * out_pad * jnp.dtype(out_dtype).itemsize)
    vmem_limit = int(2 * (param_bytes + io_bytes + act_bytes)) + (8 << 20)
    vmem_limit = min(max(vmem_limit, 16 << 20), 112 << 20)

    # All weights stay VMEM-resident.  Beyond ~half the per-generation VMEM
    # budget this scheme stops scaling (earliest on v7x's 64 MiB).
    # TODO(synk): add a pltpu.emit_pipeline weight-streaming fallback for
    # hidden sizes / layer counts whose packed weights exceed the VMEM budget.
    if param_bytes > (24 << 20):
        raise ValueError("packed weights too large for the weight-resident kernel")

    kernel = functools.partial(_mlp_kernel, num_layers, apply_scaled_tanh,
                               float(scale), float(factor))

    def call(buffered_weights):
        in_specs = [pl.BlockSpec((bm, in_features), lambda i: (i, 0))]
        for p in packed_params:
            if buffered_weights:
                # Constant index_map -> never refetched; a single buffer halves
                # the resident weight footprint (matters on v7x's 64 MiB VMEM).
                spec = pl.BlockSpec(p.shape, lambda i: (0, 0),
                                    pipeline_mode=pl.Buffered(1))
            else:
                spec = pl.BlockSpec(p.shape, lambda i: (0, 0))
            in_specs.append(spec)
        out_spec = pl.BlockSpec((bm, out_pad), lambda i: (i, 0))
        return pl.pallas_call(
            kernel,
            out_shape=jax.ShapeDtypeStruct((batch_pad, out_pad), out_dtype),
            grid=grid,
            in_specs=in_specs,
            out_specs=out_spec,
            compiler_params=pltpu.CompilerParams(
                dimension_semantics=("parallel",),
                vmem_limit_bytes=vmem_limit),
        )(x_p, *packed_params)

    try:
        y = call(True)
    except Exception:
        # Fallback if single-buffered pipeline_mode is rejected by this jax build.
        y = call(False)
    return y[:batch, :output_size]


# ---------------------------------------------------------------------------
# Init + reference
# ---------------------------------------------------------------------------
def init_params(key, input_size, hidden_size, num_layers, output_size):
    """Kaiming-uniform-like weights, zero biases, 0.25 PReLU slopes (PyTorch defaults)."""
    params = []
    in_dim = input_size
    for _ in range(num_layers):
        key, wk = jax.random.split(key)
        bound = (6.0 / in_dim) ** 0.5
        w = jax.random.uniform(wk, (in_dim, hidden_size), jnp.float32, -bound, bound)
        b = jnp.zeros((1, hidden_size), jnp.float32)
        a = jnp.full((1, hidden_size), 0.25, jnp.float32)
        params += [w, b, a]
        in_dim = hidden_size
    key, wk = jax.random.split(key)
    bound = (6.0 / in_dim) ** 0.5
    w_out = jax.random.uniform(wk, (in_dim, output_size), jnp.float32, -bound, bound)
    b_out = jnp.zeros((1, output_size), jnp.float32)
    params += [w_out, b_out]
    return params


def reference_forward(x, params, param_dtype=jnp.bfloat16):
    """Pure-JAX reference mirroring the kernel numerics (bf16 in, f32 accumulate)."""
    num_layers = (len(params) - 2) // 3
    h = x.astype(param_dtype)
    idx = 0
    for _ in range(num_layers):
        w = params[idx].astype(param_dtype)
        b = params[idx + 1].astype(jnp.float32)
        a = params[idx + 2].astype(jnp.float32)
        idx += 3
        z = jnp.dot(h, w, preferred_element_type=jnp.float32) + b
        h = jnp.where(z > 0, z, a * z).astype(param_dtype)
    w = params[idx].astype(param_dtype)
    b = params[idx + 1].astype(jnp.float32)
    return jnp.dot(h, w, preferred_element_type=jnp.float32) + b


# ---------------------------------------------------------------------------
if __name__ == "__main__":
    # batch=256 -> bm=128, grid=(2,) parallel: full MXU rows per step and both
    # v7x TensorCores get work; feature dims stay at the module's small sizes.
    batch, input_size, hidden_size, num_layers, output_size = 256, 16, 32, 3, 4
    scale, factor = 1.0, 0.1

    key = jax.random.PRNGKey(0)
    key, xk = jax.random.split(key)
    x = jax.random.normal(xk, (batch, input_size), jnp.float32)
    params = init_params(key, input_size, hidden_size, num_layers, output_size)

    param_dtype = jnp.bfloat16
    packed = pack_params(params, param_dtype)
    x_bf = x.astype(param_dtype)

    # forward()
    out = sequential_multilayer_nn(x_bf, packed, output_size)
    out = jax.block_until_ready(out)
    ref = reference_forward(x_bf, params, param_dtype)
    assert out.shape == (batch, output_size)
    assert jnp.allclose(out.astype(jnp.float32), ref, atol=1e-2, rtol=1e-2), \
        "forward mismatch vs reference"

    # with_scaled_tanh() — fused as a cheap EUP epilogue inside the kernel.
    out_t = sequential_multilayer_nn(x_bf, packed, output_size,
                                     apply_scaled_tanh=True, scale=scale, factor=factor)
    out_t = jax.block_until_ready(out_t)
    ref_t = scale * jnp.tanh(factor * ref)
    assert jnp.allclose(out_t.astype(jnp.float32), ref_t, atol=1e-2, rtol=1e-2), \
        "scaled-tanh mismatch vs reference"

    print("KERNEL_OK")
</pallas_src>

<mosaic_0001>
module attributes {stable_mosaic.version = 11 : i64} {
  func.func @_mlp_kernel(%arg0: i32, %arg1: memref<128x16xbf16, #tpu.memory_space<vmem>>, %arg2: memref<16x128xbf16, #tpu.memory_space<vmem>>, %arg3: memref<2x128xf32, #tpu.memory_space<vmem>>, %arg4: memref<128x128xbf16, #tpu.memory_space<vmem>>, %arg5: memref<2x128xf32, #tpu.memory_space<vmem>>, %arg6: memref<128x128xbf16, #tpu.memory_space<vmem>>, %arg7: memref<2x128xf32, #tpu.memory_space<vmem>>, %arg8: memref<128x128xbf16, #tpu.memory_space<vmem>>, %arg9: memref<1x128xf32, #tpu.memory_space<vmem>>, %arg10: memref<128x128xbf16, #tpu.memory_space<vmem>>) attributes {dimension_semantics = [#tpu.dimension_semantics<parallel>], iteration_bounds = array<i64: 2>, scalar_prefetch = 0 : i64, scratch_operands = 0 : i64, tpu.core_type = #tpu.core_type<tc>, window_params = [{transform_indices = @transform_0, window_bounds = array<i64: 128, 16>}, {pipeline_mode = #tpu.pipeline_mode<synchronous>, transform_indices = @transform_1, window_bounds = array<i64: 16, 128>}, {pipeline_mode = #tpu.pipeline_mode<synchronous>, transform_indices = @transform_2, window_bounds = array<i64: 2, 128>}, {pipeline_mode = #tpu.pipeline_mode<synchronous>, transform_indices = @transform_3, window_bounds = array<i64: 128, 128>}, {pipeline_mode = #tpu.pipeline_mode<synchronous>, transform_indices = @transform_4, window_bounds = array<i64: 2, 128>}, {pipeline_mode = #tpu.pipeline_mode<synchronous>, transform_indices = @transform_5, window_bounds = array<i64: 128, 128>}, {pipeline_mode = #tpu.pipeline_mode<synchronous>, transform_indices = @transform_6, window_bounds = array<i64: 2, 128>}, {pipeline_mode = #tpu.pipeline_mode<synchronous>, transform_indices = @transform_7, window_bounds = array<i64: 128, 128>}, {pipeline_mode = #tpu.pipeline_mode<synchronous>, transform_indices = @transform_8, window_bounds = array<i64: 1, 128>}, {transform_indices = @transform_9, window_bounds = array<i64: 128, 128>}]} {
    %c0 = arith.constant 0 : index
    %c0_0 = arith.constant 0 : index
    %0 = vector.load %arg1[%c0, %c0_0] : memref<128x16xbf16, #tpu.memory_space<vmem>>, vector<128x16xbf16>
    %c0_1 = arith.constant 0 : index
    %c0_2 = arith.constant 0 : index
    %1 = vector.load %arg2[%c0_1, %c0_2] : memref<16x128xbf16, #tpu.memory_space<vmem>>, vector<16x128xbf16>
    %c0_3 = arith.constant 0 : index
    %c0_4 = arith.constant 0 : index
    %2 = vector.load %arg3[%c0_3, %c0_4] : memref<2x128xf32, #tpu.memory_space<vmem>>, vector<2x128xf32>
    %3 = vector.extract_strided_slice %2 {offsets = [0, 0], sizes = [1, 128], strides = [1, 1]} : vector<2x128xf32> to vector<1x128xf32>
    %4 = vector.extract_strided_slice %2 {offsets = [1, 0], sizes = [1, 128], strides = [1, 1]} : vector<2x128xf32> to vector<1x128xf32>
    %cst = arith.constant dense<0.000000e+00> : vector<128x128xf32>
    %5 = tpu.matmul %0, %1, %cst {dimension_numbers = #tpu.dot_dimension_numbers<[1], [0], [0], [1], [0, 0, 1, 1], [], []>} : vector<128x16xbf16>, vector<16x128xbf16>, vector<128x128xf32> -> vector<128x128xf32>
    %6 = vector.broadcast %3 : vector<1x128xf32> to vector<128x128xf32>
    %7 = arith.addf %5, %6 : vector<128x128xf32>
    %cst_5 = arith.constant 0.000000e+00 : f32
    %8 = vector.broadcast %cst_5 : f32 to vector<128x128xf32>
    %9 = arith.cmpf ogt, %7, %8 : vector<128x128xf32>
    %10 = vector.broadcast %4 : vector<1x128xf32> to vector<128x128xf32>
    %11 = arith.mulf %10, %7 : vector<128x128xf32>
    %12 = arith.select %9, %7, %11 : vector<128x128xi1>, vector<128x128xf32>
    %13 = arith.truncf %12 : vector<128x128xf32> to vector<128x128xbf16>
    %c0_6 = arith.constant 0 : index
    %c0_7 = arith.constant 0 : index
    %14 = vector.load %arg4[%c0_6, %c0_7] : memref<128x128xbf16, #tpu.memory_space<vmem>>, vector<128x128xbf16>
    %c0_8 = arith.constant 0 : index
    %c0_9 = arith.constant 0 : index
    %15 = vector.load %arg5[%c0_8, %c0_9] : memref<2x128xf32, #tpu.memory_space<vmem>>, vector<2x128xf32>
    %16 = vector.extract_strided_slice %15 {offsets = [0, 0], sizes = [1, 128], strides = [1, 1]} : vector<2x128xf32> to vector<1x128xf32>
    %17 = vector.extract_strided_slice %15 {offsets = [1, 0], sizes = [1, 128], strides = [1, 1]} : vector<2x128xf32> to vector<1x128xf32>
    %cst_10 = arith.constant dense<0.000000e+00> : vector<128x128xf32>
    %18 = tpu.matmul %13, %14, %cst_10 {dimension_numbers = #tpu.dot_dimension_numbers<[1], [0], [0], [1], [0, 0, 1, 1], [], []>} : vector<128x128xbf16>, vector<128x128xbf16>, vector<128x128xf32> -> vector<128x128xf32>
    %19 = vector.broadcast %16 : vector<1x128xf32> to vector<128x128xf32>
    %20 = arith.addf %18, %19 : vector<128x128xf32>
    %cst_11 = arith.constant 0.000000e+00 : f32
    %21 = vector.broadcast %cst_11 : f32 to vector<128x128xf32>
    %22 = arith.cmpf ogt, %20, %21 : vector<128x128xf32>
    %23 = vector.broadcast %17 : vector<1x128xf32> to vector<128x128xf32>
    %24 = arith.mulf %23, %20 : vector<128x128xf32>
    %25 = arith.select %22, %20, %24 : vector<128x128xi1>, vector<128x128xf32>
    %26 = arith.truncf %25 : vector<128x128xf32> to vector<128x128xbf16>
    %c0_12 = arith.constant 0 : index
    %c0_13 = arith.constant 0 : index
    %27 = vector.load %arg6[%c0_12, %c0_13] : memref<128x128xbf16, #tpu.memory_space<vmem>>, vector<128x128xbf16>
    %c0_14 = arith.constant 0 : index
    %c0_15 = arith.constant 0 : index
    %28 = vector.load %arg7[%c0_14, %c0_15] : memref<2x128xf32, #tpu.memory_space<vmem>>, vector<2x128xf32>
    %29 = vector.extract_strided_slice %28 {offsets = [0, 0], sizes = [1, 128], strides = [1, 1]} : vector<2x128xf32> to vector<1x128xf32>
    %30 = vector.extract_strided_slice %28 {offsets = [1, 0], sizes = [1, 128], strides = [1, 1]} : vector<2x128xf32> to vector<1x128xf32>
    %cst_16 = arith.constant dense<0.000000e+00> : vector<128x128xf32>
    %31 = tpu.matmul %26, %27, %cst_16 {dimension_numbers = #tpu.dot_dimension_numbers<[1], [0], [0], [1], [0, 0, 1, 1], [], []>} : vector<128x128xbf16>, vector<128x128xbf16>, vector<128x128xf32> -> vector<128x128xf32>
    %32 = vector.broadcast %29 : vector<1x128xf32> to vector<128x128xf32>
    %33 = arith.addf %31, %32 : vector<128x128xf32>
    %cst_17 = arith.constant 0.000000e+00 : f32
    %34 = vector.broadcast %cst_17 : f32 to vector<128x128xf32>
    %35 = arith.cmpf ogt, %33, %34 : vector<128x128xf32>
    %36 = vector.broadcast %30 : vector<1x128xf32> to vector<128x128xf32>
    %37 = arith.mulf %36, %33 : vector<128x128xf32>
    %38 = arith.select %35, %33, %37 : vector<128x128xi1>, vector<128x128xf32>
    %39 = arith.truncf %38 : vector<128x128xf32> to vector<128x128xbf16>
    %c0_18 = arith.constant 0 : index
    %c0_19 = arith.constant 0 : index
    %40 = vector.load %arg8[%c0_18, %c0_19] : memref<128x128xbf16, #tpu.memory_space<vmem>>, vector<128x128xbf16>
    %c0_20 = arith.constant 0 : index
    %c0_21 = arith.constant 0 : index
    %41 = vector.load %arg9[%c0_20, %c0_21] : memref<1x128xf32, #tpu.memory_space<vmem>>, vector<1x128xf32>
    %cst_22 = arith.constant dense<0.000000e+00> : vector<128x128xf32>
    %42 = tpu.matmul %39, %40, %cst_22 {dimension_numbers = #tpu.dot_dimension_numbers<[1], [0], [0], [1], [0, 0, 1, 1], [], []>} : vector<128x128xbf16>, vector<128x128xbf16>, vector<128x128xf32> -> vector<128x128xf32>
    %43 = vector.broadcast %41 : vector<1x128xf32> to vector<128x128xf32>
    %44 = arith.addf %42, %43 : vector<128x128xf32>
    %45 = arith.truncf %44 : vector<128x128xf32> to vector<128x128xbf16>
    %c0_23 = arith.constant 0 : index
    %c0_24 = arith.constant 0 : index
    %46 = vector.load %arg10[%c0_23, %c0_24] : memref<128x128xbf16, #tpu.memory_space<vmem>>, vector<128x128xbf16>
    tpu.vector_store %arg10[%c0_23, %c0_24], %45 {strides = array<i32>} : memref<128x128xbf16, #tpu.memory_space<vmem>>, vector<128x128xbf16>,
    return
  }
  func.func @transform_0(%arg0: i32) -> (i32, i32) {
    %c0_i32 = arith.constant 0 : i32
    %c0_i32_0 = arith.constant 0 : i32
    return %arg0, %c0_i32 : i32, i32
  }
  func.func @transform_1(%arg0: i32) -> (i32, i32) {
    %c0_i32 = arith.constant 0 : i32
    %c0_i32_0 = arith.constant 0 : i32
    %c0_i32_1 = arith.constant 0 : i32
    return %c0_i32, %c0_i32_0 : i32, i32
  }
  func.func @transform_2(%arg0: i32) -> (i32, i32) {
    %c0_i32 = arith.constant 0 : i32
    %c0_i32_0 = arith.constant 0 : i32
    %c0_i32_1 = arith.constant 0 : i32
    return %c0_i32, %c0_i32_0 : i32, i32
  }
  func.func @transform_3(%arg0: i32) -> (i32, i32) {
    %c0_i32 = arith.constant 0 : i32
    %c0_i32_0 = arith.constant 0 : i32
    %c0_i32_1 = arith.constant 0 : i32
    return %c0_i32, %c0_i32_0 : i32, i32
  }
  func.func @transform_4(%arg0: i32) -> (i32, i32) {
    %c0_i32 = arith.constant 0 : i32
    %c0_i32_0 = arith.constant 0 : i32
    %c0_i32_1 = arith.constant 0 : i32
    return %c0_i32, %c0_i32_0 : i32, i32
  }
  func.func @transform_5(%arg0: i32) -> (i32, i32) {
    %c0_i32 = arith.constant 0 : i32
    %c0_i32_0 = arith.constant 0 : i32
    %c0_i32_1 = arith.constant 0 : i32
    return %c0_i32, %c0_i32_0 : i32, i32
  }
  func.func @transform_6(%arg0: i32) -> (i32, i32) {
    %c0_i32 = arith.constant 0 : i32
    %c0_i32_0 = arith.constant 0 : i32
    %c0_i32_1 = arith.constant 0 : i32
    return %c0_i32, %c0_i32_0 : i32, i32
  }
  func.func @transform_7(%arg0: i32) -> (i32, i32) {
    %c0_i32 = arith.constant 0 : i32
    %c0_i32_0 = arith.constant 0 : i32
    %c0_i32_1 = arith.constant 0 : i32
    return %c0_i32, %c0_i32_0 : i32, i32
  }
  func.func @transform_8(%arg0: i32) -> (i32, i32) {
    %c0_i32 = arith.constant 0 : i32
    %c0_i32_0 = arith.constant 0 : i32
    %c0_i32_1 = arith.constant 0 : i32
    return %c0_i32, %c0_i32_0 : i32, i32
  }
  func.func @transform_9(%arg0: i32) -> (i32, i32) {
    %c0_i32 = arith.constant 0 : i32
    %c0_i32_0 = arith.constant 0 : i32
    return %arg0, %c0_i32 : i32, i32
  }
}

module attributes {stable_mosaic.version = 11 : i64} {
  func.func @_mlp_kernel(%arg0: i32, %arg1: memref<128x16xbf16, #tpu.memory_space<vmem>>, %arg2: memref<16x128xbf16, #tpu.memory_space<vmem>>, %arg3: memref<2x128xf32, #tpu.memory_space<vmem>>, %arg4: memref<128x128xbf16, #tpu.memory_space<vmem>>, %arg5: memref<2x128xf32, #tpu.memory_space<vmem>>, %arg6: memref<128x128xbf16, #tpu.memory_space<vmem>>, %arg7: memref<2x128xf32, #tpu.memory_space<vmem>>, %arg8: memref<128x128xbf16, #tpu.memory_space<vmem>>, %arg9: memref<1x128xf32, #tpu.memory_space<vmem>>, %arg10: memref<128x128xbf16, #tpu.memory_space<vmem>>) attributes {dimension_semantics = [#tpu.dimension_semantics<parallel>], iteration_bounds = array<i64: 2>, scalar_prefetch = 0 : i64, scratch_operands = 0 : i64, tpu.core_type = #tpu.core_type<tc>, window_params = [{transform_indices = @transform_0, window_bounds = array<i64: 128, 16>}, {pipeline_mode = #tpu.pipeline_mode<synchronous>, transform_indices = @transform_1, window_bounds = array<i64: 16, 128>}, {pipeline_mode = #tpu.pipeline_mode<synchronous>, transform_indices = @transform_2, window_bounds = array<i64: 2, 128>}, {pipeline_mode = #tpu.pipeline_mode<synchronous>, transform_indices = @transform_3, window_bounds = array<i64: 128, 128>}, {pipeline_mode = #tpu.pipeline_mode<synchronous>, transform_indices = @transform_4, window_bounds = array<i64: 2, 128>}, {pipeline_mode = #tpu.pipeline_mode<synchronous>, transform_indices = @transform_5, window_bounds = array<i64: 128, 128>}, {pipeline_mode = #tpu.pipeline_mode<synchronous>, transform_indices = @transform_6, window_bounds = array<i64: 2, 128>}, {pipeline_mode = #tpu.pipeline_mode<synchronous>, transform_indices = @transform_7, window_bounds = array<i64: 128, 128>}, {pipeline_mode = #tpu.pipeline_mode<synchronous>, transform_indices = @transform_8, window_bounds = array<i64: 1, 128>}, {transform_indices = @transform_9, window_bounds = array<i64: 128, 128>}]} {
    %c0 = arith.constant 0 : index
    %c0_0 = arith.constant 0 : index
    %0 = vector.load %arg1[%c0, %c0_0] : memref<128x16xbf16, #tpu.memory_space<vmem>>, vector<128x16xbf16>
    %c0_1 = arith.constant 0 : index
    %c0_2 = arith.constant 0 : index
    %1 = vector.load %arg2[%c0_1, %c0_2] : memref<16x128xbf16, #tpu.memory_space<vmem>>, vector<16x128xbf16>
    %c0_3 = arith.constant 0 : index
    %c0_4 = arith.constant 0 : index
    %2 = vector.load %arg3[%c0_3, %c0_4] : memref<2x128xf32, #tpu.memory_space<vmem>>, vector<2x128xf32>
    %3 = vector.extract_strided_slice %2 {offsets = [0, 0], sizes = [1, 128], strides = [1, 1]} : vector<2x128xf32> to vector<1x128xf32>
    %4 = vector.extract_strided_slice %2 {offsets = [1, 0], sizes = [1, 128], strides = [1, 1]} : vector<2x128xf32> to vector<1x128xf32>
    %cst = arith.constant dense<0.000000e+00> : vector<128x128xf32>
    %5 = tpu.matmul %0, %1, %cst {dimension_numbers = #tpu.dot_dimension_numbers<[1], [0], [0], [1], [0, 0, 1, 1], [], []>} : vector<128x16xbf16>, vector<16x128xbf16>, vector<128x128xf32> -> vector<128x128xf32>
    %6 = vector.broadcast %3 : vector<1x128xf32> to vector<128x128xf32>
    %7 = arith.addf %5, %6 : vector<128x128xf32>
    %cst_5 = arith.constant 0.000000e+00 : f32
    %8 = vector.broadcast %cst_5 : f32 to vector<128x128xf32>
    %9 = arith.cmpf ogt, %7, %8 : vector<128x128xf32>
    %10 = vector.broadcast %4 : vector<1x128xf32> to vector<128x128xf32>
    %11 = arith.mulf %10, %7 : vector<128x128xf32>
    %12 = arith.select %9, %7, %11 : vector<128x128xi1>, vector<128x128xf32>
    %13 = arith.truncf %12 : vector<128x128xf32> to vector<128x128xbf16>
    %c0_6 = arith.constant 0 : index
    %c0_7 = arith.constant 0 : index
    %14 = vector.load %arg4[%c0_6, %c0_7] : memref<128x128xbf16, #tpu.memory_space<vmem>>, vector<128x128xbf16>
    %c0_8 = arith.constant 0 : index
    %c0_9 = arith.constant 0 : index
    %15 = vector.load %arg5[%c0_8, %c0_9] : memref<2x128xf32, #tpu.memory_space<vmem>>, vector<2x128xf32>
    %16 = vector.extract_strided_slice %15 {offsets = [0, 0], sizes = [1, 128], strides = [1, 1]} : vector<2x128xf32> to vector<1x128xf32>
    %17 = vector.extract_strided_slice %15 {offsets = [1, 0], sizes = [1, 128], strides = [1, 1]} : vector<2x128xf32> to vector<1x128xf32>
    %cst_10 = arith.constant dense<0.000000e+00> : vector<128x128xf32>
    %18 = tpu.matmul %13, %14, %cst_10 {dimension_numbers = #tpu.dot_dimension_numbers<[1], [0], [0], [1], [0, 0, 1, 1], [], []>} : vector<128x128xbf16>, vector<128x128xbf16>, vector<128x128xf32> -> vector<128x128xf32>
    %19 = vector.broadcast %16 : vector<1x128xf32> to vector<128x128xf32>
    %20 = arith.addf %18, %19 : vector<128x128xf32>
    %cst_11 = arith.constant 0.000000e+00 : f32
    %21 = vector.broadcast %cst_11 : f32 to vector<128x128xf32>
    %22 = arith.cmpf ogt, %20, %21 : vector<128x128xf32>
    %23 = vector.broadcast %17 : vector<1x128xf32> to vector<128x128xf32>
    %24 = arith.mulf %23, %20 : vector<128x128xf32>
    %25 = arith.select %22, %20, %24 : vector<128x128xi1>, vector<128x128xf32>
    %26 = arith.truncf %25 : vector<128x128xf32> to vector<128x128xbf16>
    %c0_12 = arith.constant 0 : index
    %c0_13 = arith.constant 0 : index
    %27 = vector.load %arg6[%c0_12, %c0_13] : memref<128x128xbf16, #tpu.memory_space<vmem>>, vector<128x128xbf16>
    %c0_14 = arith.constant 0 : index
    %c0_15 = arith.constant 0 : index
    %28 = vector.load %arg7[%c0_14, %c0_15] : memref<2x128xf32, #tpu.memory_space<vmem>>, vector<2x128xf32>
    %29 = vector.extract_strided_slice %28 {offsets = [0, 0], sizes = [1, 128], strides = [1, 1]} : vector<2x128xf32> to vector<1x128xf32>
    %30 = vector.extract_strided_slice %28 {offsets = [1, 0], sizes = [1, 128], strides = [1, 1]} : vector<2x128xf32> to vector<1x128xf32>
    %cst_16 = arith.constant dense<0.000000e+00> : vector<128x128xf32>
    %31 = tpu.matmul %26, %27, %cst_16 {dimension_numbers = #tpu.dot_dimension_numbers<[1], [0], [0], [1], [0, 0, 1, 1], [], []>} : vector<128x128xbf16>, vector<128x128xbf16>, vector<128x128xf32> -> vector<128x128xf32>
    %32 = vector.broadcast %29 : vector<1x128xf32> to vector<128x128xf32>
    %33 = arith.addf %31, %32 : vector<128x128xf32>
    %cst_17 = arith.constant 0.000000e+00 : f32
    %34 = vector.broadcast %cst_17 : f32 to vector<128x128xf32>
    %35 = arith.cmpf ogt, %33, %34 : vector<128x128xf32>
    %36 = vector.broadcast %30 : vector<1x128xf32> to vector<128x128xf32>
    %37 = arith.mulf %36, %33 : vector<128x128xf32>
    %38 = arith.select %35, %33, %37 : vector<128x128xi1>, vector<128x128xf32>
    %39 = arith.truncf %38 : vector<128x128xf32> to vector<128x128xbf16>
    %c0_18 = arith.constant 0 : index
    %c0_19 = arith.constant 0 : index
    %40 = vector.load %arg8[%c0_18, %c0_19] : memref<128x128xbf16, #tpu.memory_space<vmem>>, vector<128x128xbf16>
    %c0_20 = arith.constant 0 : index
    %c0_21 = arith.constant 0 : index
    %41 = vector.load %arg9[%c0_20, %c0_21] : memref<1x128xf32, #tpu.memory_space<vmem>>, vector<1x128xf32>
    %cst_22 = arith.constant dense<0.000000e+00> : vector<128x128xf32>
    %42 = tpu.matmul %39, %40, %cst_22 {dimension_numbers = #tpu.dot_dimension_numbers<[1], [0], [0], [1], [0, 0, 1, 1], [], []>} : vector<128x128xbf16>, vector<128x128xbf16>, vector<128x128xf32> -> vector<128x128xf32>
    %43 = vector.broadcast %41 : vector<1x128xf32> to vector<128x128xf32>
    %44 = arith.addf %42, %43 : vector<128x128xf32>
    %45 = arith.truncf %44 : vector<128x128xf32> to vector<128x128xbf16>
    %c0_23 = arith.constant 0 : index
    %c0_24 = arith.constant 0 : index
    %46 = vector.load %arg10[%c0_23, %c0_24] : memref<128x128xbf16, #tpu.memory_space<vmem>>, vector<128x128xbf16>
    tpu.vector_store %arg10[%c0_23, %c0_24], %45 {strides = array<i32>} : memref<128x128xbf16, #tpu.memory_space<vmem>>, vector<128x128xbf16>,
    return
  }
  func.func @transform_0(%arg0: i32) -> (i32, i32) {
    %c0_i32 = arith.constant 0 : i32
    %c0_i32_0 = arith.constant 0 : i32
    return %arg0, %c0_i32 : i32, i32
  }
  func.func @transform_1(%arg0: i32) -> (i32, i32) {
    %c0_i32 = arith.constant 0 : i32
    %c0_i32_0 = arith.constant 0 : i32
    %c0_i32_1 = arith.constant 0 : i32
    return %c0_i32, %c0_i32_0 : i32, i32
  }
  func.func @transform_2(%arg0: i32) -> (i32, i32) {
    %c0_i32 = arith.constant 0 : i32
    %c0_i32_0 = arith.constant 0 : i32
    %c0_i32_1 = arith.constant 0 : i32
    return %c0_i32, %c0_i32_0 : i32, i32
  }
  func.func @transform_3(%arg0: i32) -> (i32, i32) {
    %c0_i32 = arith.constant 0 : i32
    %c0_i32_0 = arith.constant 0 : i32
    %c0_i32_1 = arith.constant 0 : i32
    return %c0_i32, %c0_i32_0 : i32, i32
  }
  func.func @transform_4(%arg0: i32) -> (i32, i32) {
    %c0_i32 = arith.constant 0 : i32
    %c0_i32_0 = arith.constant 0 : i32
    %c0_i32_1 = arith.constant 0 : i32
    return %c0_i32, %c0_i32_0 : i32, i32
  }
  func.func @transform_5(%arg0: i32) -> (i32, i32) {
    %c0_i32 = arith.constant 0 : i32
    %c0_i32_0 = arith.constant 0 : i32
    %c0_i32_1 = arith.constant 0 : i32
    return %c0_i32, %c0_i32_0 : i32, i32
  }
  func.func @transform_6(%arg0: i32) -> (i32, i32) {
    %c0_i32 = arith.constant 0 : i32
    %c0_i32_0 = arith.constant 0 : i32
    %c0_i32_1 = arith.constant 0 : i32
    return %c0_i32, %c0_i32_0 : i32, i32
  }
  func.func @transform_7(%arg0: i32) -> (i32, i32) {
    %c0_i32 = arith.constant 0 : i32
    %c0_i32_0 = arith.constant 0 : i32
    %c0_i32_1 = arith.constant 0 : i32
    return %c0_i32, %c0_i32_0 : i32, i32
  }
  func.func @transform_8(%arg0: i32) -> (i32, i32) {
    %c0_i32 = arith.constant 0 : i32
    %c0_i32_0 = arith.constant 0 : i32
    %c0_i32_1 = arith.constant 0 : i32
    return %c0_i32, %c0_i32_0 : i32, i32
  }
  func.func @transform_9(%arg0: i32) -> (i32, i32) {
    %c0_i32 = arith.constant 0 : i32
    %c0_i32_0 = arith.constant 0 : i32
    return %arg0, %c0_i32 : i32, i32
  }
}

</mosaic_0001>

<bundles_post_ra>
// kernel: tpu_custom_call.1
= control target key start
LH: loop header
LB: loop body
LE: loop exit
PB: predicated region body
PF: predicated region fallthrough
CT: control target
= control target key end

     0   :  { %14 = vsyncpa [#allocation3], 0  ;;  %s2326_s0 = inlined_call_operand.vmem [shape: bf16[256,16], index: 0, kind: input, shape index: {}]   ;;  %s2327_s1 = inlined_call_operand.vmem [shape: bf16[16,128], index: 1, kind: input, shape index: {}]   ;;  %s2328_s2 = inlined_call_operand.vmem [shape: f32[2,128], index: 2, kind: input, shape index: {}]   ;;  %s2329_s3 = inlined_call_operand.vmem [shape: bf16[128,128], index: 3, kind: input, shape index: {}]   ;;  %s2330_s4 = inlined_call_operand.vmem [shape: f32[2,128], index: 4, kind: input, shape index: {}]   ;;  %s2331_s5 = inlined_call_operand.vmem [shape: bf16[128,128], index: 5, kind: input, shape index: {}]   ;;  %s2332_s6 = inlined_call_operand.vmem [shape: f32[2,128], index: 6, kind: input, shape index: {}]   ;;  %s2333_s7 = inlined_call_operand.hbm [shape: bf16[128,128], index: 7, kind: input, shape index: {}]   ;;  %s2334_s8 = inlined_call_operand.vmem [shape: f32[1,128], index: 8, kind: input, shape index: {}]   ;;  %s2335_s9 = inlined_call_operand.hbm [shape: bf16[256,128], index: 9, kind: output, shape index: {}]  }
   0x1   :  { %15 = vsyncpa [#allocation4], 0 }
   0x2   :  { %17 = vsyncpa [#allocation4 + $0x1], 0  ;;  %s1951_s30 = smov 0   ;;  %s1953_s10 = smov 0  }
   0x3   :  { %s1955_s11 = smov 0   ;;  %s1957_s12 = smov 0  }
   0x4 LB: > { %s1972_s13 = sadd.s32 4294967295, %s1893_s12   ;;  %s1389_s14 = sadd.s32 4294967294, %s1893_s12   ;;  %s1893_s12 = sphi %s1957_s12, %s2351_s12   ;;  %s1889_s11 = sphi %s1955_s11, %s2350_s11   ;;  %s1885_s10 = sphi %s1953_s10, %s2349_s10   ;;  %s1881_s30 = sphi %s1951_s30, %s2348_s30  }
   0x5   : > { %s1976_s15 = sadd.s32 1, %s1893_s12   ;;  %s224_s16 = sadd.s32 1, %s1889_s11 }
   0x6   : > { %s221_s17 = ssub.s32 %s1893_s12, %s1976_s15  ;;  %p234_p0 = scmp.ne.s32.totalorder %s1889_s11, %s1885_s10 }
   0x7   : > { %p222_p1 = scmp.eq.s32.totalorder %s221_s17, 0  ;;  %p235_p2 = scmp.eq.s32.totalorder %s1972_s13, 1 }
   0x8   : > { %p240_p3 = scmp.ne.s32.totalorder %s1885_s10, %s1881_s30  ;;  %p241_p4 = scmp.eq.s32.totalorder %s1389_s14, 1 }
   0x9   : > { %s1987_s18 = scalar_select %p222_p1, %s1889_s11, %s224_s16  }
   0xa   : > { %p1989_p5 = por %p235_p2, %p234_p0  ;;  %p1993_p6 = por %p241_p4, %p240_p3 }
   0xb   : > { %p1390_p7 = scmp.ge.s32.totalorder %s1893_s12, 1  ;;  %p248_p8 = scmp.lt.s32.totalorder %s1893_s12, 3 }
   0xc   : > { %s2339_s19 = scalar_select %p1989_p5, 1, 0 }
   0xd   : > { %s2340_s20 = scalar_select %p1993_p6, 1, 0 }
   0xe   : > { %p2336_p9 = scmp.eq.s32.totalorder %s1972_s13, 0  ;;  %p2000_p10 = pnand %p1390_p7, %p248_p8 }
   0xf   : > { %s1895_s22 = smov [#allocation2]   ;;  %s1799_s27 = scalar_lea.hbm %s2333_s7, 1024 }
  0x10   : > { %s2341_s21 = scalar_select %p2000_p10, 1, 0 }
  0x11   : > { %s278_s23 = sshll.u32 %s1895_s22, 4  ;;  %p1718_p11 = pneg %p2000_p10  ;;  %s279_s23 = int_to_ptr.vmem [resolvable:$true] %s278_s23 }
  0x12   : > { %p1800_p13 = scmp.ne.s32.totalorder %s2333_s7, %s1799_s27  ;;  %p1806_p3 = scmp.lt.u32.totalorder %s1799_s27, %s2333_s7 }
  0x13   : > { %p2008_p12 = pnand %p2336_p9, %p1718_p11 }
  0x15   : > { %p1801_p0 = pneg %p2008_p12 }
  0x17   : > { %p1802_p1 = pnand %p1801_p0, %p1800_p13 }
  0x19   : > { %p1803_p2 = pneg %p1802_p1 }
  0x1b   : > { %p1808_p4 = pnand %p1806_p3, %p1803_p2 }
  0x1d   : > { %1811 = shalt.err (!%p1808_p4)
}
  0x1e   : > { %s1812_s17 = scalar_lea.vmem %s279_s23, 1024  ;;  %p1820_p9 = scmp.lt.s32.totalorder %s279_s23, %s279_s23 }
  0x1f   : > { %p1813_p7 = scmp.ne.s32.totalorder %s279_s23, %s1812_s17  ;;  %p1821_p6 = scmp.lt.s32.totalorder %s1812_s17, %s1812_s17 }
  0x21   : > { %p1815_p8 = pnand %p1813_p7, %p1801_p0  ;;  %p1822_p5 = por %p1821_p6, %p1820_p9 }
  0x23   : > { %p1816_p11 = pneg %p1815_p8 }
  0x25   : > { %p1823_p10 = pnand %p1822_p5, %p1816_p11 }
  0x27   : > { %1826 = shalt.err (!%p1823_p10)
}
  0x28   : > { %s1896_s22 = smov 64   ;;  %s1897_s25 = smov 4  }
  0x29   : > { %1721 = dma.hbm_to_vmem [thread:$0]  (!%p2008_p12), %s2333_s7, 1024, %s279_s23, [#allocation3], %s1896_s22, %s1896_s22, %s1897_s25  }
  0x2a   : > { %p2343_p13 = scmp.ne.s32.totalorder %s2341_s21, 0 }
  0x2b   : > { %p2344_p1 = scmp.eq.s32.totalorder (!%p2343_p13), %s1972_s13, 0 }
  0x2c   : > { %306 = sbr.rel (%p2343_p13) target bundleno = 987 (0x3db), region = 56 }
  0x33   : > { %1872 = dma.done.wait (%p2344_p1), [#allocation3], 1024   ;;  %p2345_p0 = pmov %p2344_p1 }
  0x34   : > { %s1396_s27 = sshll.u32 %s1972_s13, 4  ;;  %v1766_v0 = vld [vmem:[%s2327_s1] sm:$0xff]   ;;  %vm419_vm0 = vcmask 130048   ;;  %v1776_v6 = vld [vmem:[%s2329_s3 + $0x8] sm:$0xff]   ;;  %v1777_v8 = vld [vmem:[%s2329_s3 + $0x10] sm:$0xff]   ;;  %v369_v23 = vlaneseq  ;;  %s339_s26 = sand.u32 1, %s1885_s10  }
  0x35   : > { %1874 = vsyncadd (%p2345_p0), [#allocation3], 4294966272  ;;  %p343_p5 = scmp.lt.s32.totalorder %s1396_s27, 31  ;;  %1582 = vmatprep.subr.bf16.mxu0 %v1766_v0  ;;  %v1775_v5 = vld [vmem:[%s2329_s3] sm:$0xff]   ;;  %v1778_v9 = vld [vmem:[%s2329_s3 + $0x18] sm:$0xff]   ;;  %s1477_s24 = sshll.u32 %s1972_s13, 10 }
  0x36   : > { %1583 = vmatpush3.bf16.msra.mxu0 %v1766_v0  ;;  %1600 = vmatprep.subr.bf16.mxu1 %v1775_v5  ;;  %v1779_v12 = vld [vmem:[%s2329_s3 + $0x20] sm:$0xff]   ;;  %v1780_v14 = vld [vmem:[%s2329_s3 + $0x28] sm:$0xff]   ;;  %v1781_v15 = vld [vmem:[%s2329_s3 + $0x30] sm:$0xff]   ;;  %v370_v24 = vshrl.u32 %v369_v23, 7  ;;  %s2279_s21 = scalar_lea.hbm %s2335_s9, %s1477_s24  ;;  %s2285_s13 = scalar_lea.sflag [#allocation4], %s339_s26 }
  0x37   : > { %s2353_s27 = smov (!%p343_p5, %s1396_s27), 31  ;;  %1601 = vmatpush3.bf16.msra.mxu1 %v1775_v5  ;;  %v1782_v16 = vld [vmem:[%s2329_s3 + $0x38] sm:$0xff]   ;;  %v1783_v17 = vld [vmem:[%s2331_s5] sm:$0xff]   ;;  %v1784_v18 = vld [vmem:[%s2331_s5 + $0x8] sm:$0xff]   ;;  %p2346_p9 = scmp.ne.s32.totalorder %s2339_s19, 0 }
  0x38   : > { %s1397_s29 = sshll.u32 %s2353_s27, 2  ;;  %1602 = vmatprep.subr.bf16.mxu1 %v1776_v6  ;;  %1632 = vmatprep.subr.bf16.mxu0 %v1783_v17  ;;  %v1785_v19 = vld [vmem:[%s2331_s5 + $0x10] sm:$0xff]   ;;  %v1786_v20 = vld [vmem:[%s2331_s5 + $0x18] sm:$0xff]   ;;  %v1787_v21 = vld [vmem:[%s2331_s5 + $0x20] sm:$0xff]   ;;  %v2101_v25 = vsub.s32 0, %v370_v24  ;;  %v2106_v27 = vsub.s32 1, %v370_v24 }
  0x39   : > { %s2038_s16 = scalar_lea.vmem %s2326_s0, %s1397_s29  ;;  %v1788_v22 = vld [vmem:[%s2331_s5 + $0x28] sm:$0xff]   ;;  %v368_v26 = vld [vmem:[%s2328_s2] sm:$0x3]  ;;  %s1395_s27 = sshll.u32 %s339_s26, 6 }
  0x3a   : > { %v1767_v1 = vld [vmem:[%s2038_s16] sm:$0xff]   ;;  %v1768_v2 = vld [vmem:[%s2038_s16 + $0x8] sm:$0xff]   ;;  %v1769_v3 = vld [vmem:[%s2038_s16 + $0x10] sm:$0xff]   ;;  %v2109_v28 = vrot.slane %v368_v26, %v2101_v25  ;;  %v2112_v29 = vrot.slane %v368_v26, %v2106_v27  ;;  %s2264_s29 = scalar_lea.vmem [#allocation5], %s1395_s27  ;;  %s1898_s25 = smov [#allocation5]  }
  0x3b   : > { %1584 = vmatprep.mubr.msk.bf16.mxu0 %vm419_vm0, %v1767_v1  ;;  %v1770_v4 = vld [vmem:[%s2038_s16 + $0x18] sm:$0xff]   ;;  %v1771_v7 = vld [vmem:[%s2038_s16 + $0x20] sm:$0xff]   ;;  %v1772_v10 = vld [vmem:[%s2038_s16 + $0x28] sm:$0xff]   ;;  %1603 = vmatpush3.bf16.msra.mxu1 %v1776_v6  ;;  %s1315_s14 = sshll.u32 %s2264_s29, 4  ;;  %s1831_s28 = sshll.u32 %s1898_s25, 4  ;;  %s2274_s14 = int_to_ptr.vmem [resolvable:$true] %s1315_s14  ;;  %s1832_s28 = int_to_ptr.vmem [resolvable:$false] %s1831_s28 }
  0x3c   : > { %1585 = vmatmul.mubr.msk.bf16.vlgmr.msra.gmra.mrb[0].mxu0 %vm419_vm0, %v1768_v2  ;;  %v1773_v11 = vld [vmem:[%s2038_s16 + $0x30] sm:$0xff]   ;;  %1604 = vmatprep.subr.bf16.mxu1 %v1777_v8  ;;  %v1774_v13 = vld [vmem:[%s2038_s16 + $0x38] sm:$0xff]   ;;  %s1827_s22 = scalar_lea.vmem %s2274_s14, 1024  ;;  %s1833_s16 = scalar_lea.vmem %s1832_s28, 2048 }
  0x3d   : > { %1588 = vmatprep.mubr.msk.bf16.mxu0 %vm419_vm0, %v1769_v3  ;;  %1633 = vmatpush3.bf16.msra.mxu0 %v1783_v17  ;;  %p1828_p6 = scmp.ne.s32.totalorder %s2274_s14, %s1827_s22  ;;  %p1834_p2 = scmp.lt.s32.totalorder %s2274_s14, %s1832_s28 }
  0x3e   : > { %1634 = vmatprep.subr.bf16.mxu0 %v1784_v18  ;;  %p1835_p3 = scmp.lt.s32.totalorder %s1833_s16, %s1827_s22 }
  0x3f   : > { %1605 = vmatpush3.bf16.msra.mxu1 %v1777_v8  ;;  %p1829_p10 = pnand %p1828_p6, %p2346_p9 }
  0x40   : > { %1606 = vmatprep.subr.bf16.mxu1 %v1778_v9  ;;  %p1836_p4 = por %p1835_p3, %p1834_p2 }
  0x41   : > { %1635 = vmatpush3.bf16.msra.mxu0 %v1784_v18  ;;  %p1830_p12 = pneg %p1829_p10 }
  0x42   : > { %1636 = vmatprep.subr.bf16.mxu0 %v1785_v19 }
  0x43   : > { %1607 = vmatpush3.bf16.msra.mxu1 %v1778_v9  ;;  %p1837_p7 = pnand %p1836_p4, %p1830_p12 }
  0x44   : > { %1589 = vmatmul.mubr.msk.bf16.gmra.mrb[4].mxu0 %vm419_vm0, %v1770_v4  ;;  %1608 = vmatprep.subr.bf16.mxu1 %v1779_v12 }
  0x45   : > { %1592 = vmatprep.mubr.msk.bf16.mxu0 %vm419_vm0, %v1771_v7  ;;  %1637 = vmatpush3.bf16.msra.mxu0 %v1785_v19 }
  0x46   : > { %1638 = vmatprep.subr.bf16.mxu0 %v1786_v20 }
  0x47   : > { %1609 = vmatpush3.bf16.msra.mxu1 %v1779_v12 }
  0x48   : > { %1610 = vmatprep.subr.bf16.mxu1 %v1780_v14 }
  0x49   : > { %1639 = vmatpush3.bf16.msra.mxu0 %v1786_v20 }
  0x4a   : > { %1640 = vmatprep.subr.bf16.mxu0 %v1787_v21 }
  0x4b   : > { %1611 = vmatpush3.bf16.msra.mxu1 %v1780_v14 }
  0x4c   : > { %1593 = vmatmul.mubr.msk.bf16.gmra.mrb[8].mxu0 %vm419_vm0, %v1772_v10  ;;  %1612 = vmatprep.subr.bf16.mxu1 %v1781_v15 }
  0x4d   : > { %1596 = vmatprep.mubr.msk.bf16.mxu0 %vm419_vm0, %v1773_v11  ;;  %1641 = vmatpush3.bf16.msra.mxu0 %v1787_v21 }
  0x4e   : > { %1642 = vmatprep.subr.bf16.mxu0 %v1788_v22 }
  0x4f   : > { %1613 = vmatpush3.bf16.msra.mxu1 %v1781_v15 }
  0x50   : > { %1614 = vmatprep.subr.bf16.mxu1 %v1782_v16 }
  0x51   : > { %1643 = vmatpush3.bf16.msra.mxu0 %v1788_v22 }
  0x53   : > { %1615 = vmatpush3.bf16.msra.mxu1 %v1782_v16 }
  0x54   : > { %1597 = vmatmul.mubr.msk.bf16.gmra.mrb[12].mxu0 %vm419_vm0, %v1774_v13 }
 0x10f   : > { %v1586_v30 = vpop.f32.mrb[0].mxu0 }
 0x110   : > { %v487_v31 = vadd.f32 %v1586_v30, %v2109_v28  ;;  %v478_v32 = vpop.f32.mrb[1].mxu0 }
 0x111   : > { %v479_v33 = vadd.f32 %v478_v32, %v2109_v28  ;;  %v1587_v34 = vpop.f32.mrb[2].mxu0 }
 0x112   : > { %v563_v35 = vmul.f32 %v2112_v29, %v487_v31  ;;  %v490_v36 = vadd.f32 %v1587_v34, %v2109_v28  ;;  %v481_v37 = vpop.f32.mrb[3].mxu0  ;;  %vm543_vm1 = vcmp.gt.f32.partialorder %v487_v31, 0.0 }
 0x113   : > { %v561_v38 = vmul.f32 %v2112_v29, %v479_v33  ;;  %v482_v39 = vadd.f32 %v481_v37, %v2109_v28  ;;  %vm541_vm3 = vcmp.gt.f32.partialorder %v479_v33, 0.0 }
 0x114   : > { %vm544_vm2 = vcmp.gt.f32.partialorder %v490_v36, 0.0  ;;  %v564_v40 = vmul.f32 %v2112_v29, %v490_v36  ;;  %v579_v42 = vsel %vm543_vm1, %v487_v31, %v563_v35 }
 0x115   : > { %v562_v41 = vmul.f32 %v2112_v29, %v482_v39  ;;  %vm542_vm4 = vcmp.gt.f32.partialorder %v482_v39, 0.0  ;;  %v577_v45 = vsel %vm541_vm3, %v479_v33, %v561_v38 }
 0x116   : > { %v580_v43 = vsel %vm544_vm2, %v490_v36, %v564_v40 }
 0x117   : > { %v1590_v44 = vpop.f32.mrb[4].mxu0  ;;  %v578_v46 = vsel %vm542_vm4, %v482_v39, %v562_v41  ;;  %v594_v47 = vpack.c.bf16 %v580_v43, %v579_v42  ;;  %v1790_v42 = vld [vmem:[%s2331_s5 + $0x38] sm:$0xff]   ;;  %v2152_v43 = vld [vmem:[#allocation2 + $0x8] sm:$0xff]  }
 0x118   : > { %v503_v48 = vadd.f32 %v1590_v44, %v2109_v28  ;;  %v494_v49 = vpop.f32.mrb[5].mxu0  ;;  %v593_v50 = vpack.c.bf16 %v578_v46, %v577_v45  ;;  %v2155_v44 = vld [vmem:[#allocation2 + $0x10] sm:$0xff]   ;;  %v2159_v45 = vld [vmem:[#allocation2 + $0x18] sm:$0xff]   ;;  %v2163_v46 = vld [vmem:[#allocation2 + $0x20] sm:$0xff]  }
 0x119   : > { %v495_v51 = vadd.f32 %v494_v49, %v2109_v28  ;;  %v1591_v52 = vpop.f32.mrb[6].mxu0 }
 0x11a   : > { %v567_v53 = vmul.f32 %v2112_v29, %v503_v48  ;;  %v506_v54 = vadd.f32 %v1591_v52, %v2109_v28  ;;  %v497_v55 = vpop.f32.mrb[7].mxu0  ;;  %1616 = vmatprep.mubr.bf16.mxu1 %v593_v50  ;;  %vm547_vm5 = vcmp.gt.f32.partialorder %v503_v48, 0.0 }
 0x11b   : > { %v565_v56 = vmul.f32 %v2112_v29, %v495_v51  ;;  %v498_v57 = vadd.f32 %v497_v55, %v2109_v28  ;;  %1617 = vmatmul.mubr.bf16.vlgmr.msra.gmra.mrb[0].mxu1 %v594_v47  ;;  %vm545_vm6 = vcmp.gt.f32.partialorder %v495_v51, 0.0  ;;  %v617_v47 = vld [vmem:[%s2330_s4] sm:$0x3] }
 0x11c   : > { %vm548_vm7 = vcmp.gt.f32.partialorder %v506_v54, 0.0  ;;  %v568_v58 = vmul.f32 %v2112_v29, %v506_v54  ;;  %v583_v60 = vsel %vm547_vm5, %v503_v48, %v567_v53  ;;  %v2172_v48 = vrot.slane %v617_v47, %v2101_v25 }
 0x11d   : > { %vm546_vm8 = vcmp.gt.f32.partialorder %v498_v57, 0.0  ;;  %v566_v59 = vmul.f32 %v2112_v29, %v498_v57  ;;  %v581_v63 = vsel %vm545_vm6, %v495_v51, %v565_v56  ;;  %v2175_v49 = vrot.slane %v617_v47, %v2106_v27 }
 0x11e   : > { %v584_v61 = vsel %vm548_vm7, %v506_v54, %v568_v58 }
 0x11f   : > { %v1594_v62 = vpop.f32.mrb[8].mxu0  ;;  %v582_v0 = vsel %vm546_vm8, %v498_v57, %v566_v59  ;;  %v596_v1 = vpack.c.bf16 %v584_v61, %v583_v60 }
 0x120   : > { %v519_v2 = vadd.f32 %v1594_v62, %v2109_v28  ;;  %v510_v3 = vpop.f32.mrb[9].mxu0  ;;  %v595_v4 = vpack.c.bf16 %v582_v0, %v581_v63 }
 0x121   : > { %v511_v5 = vadd.f32 %v510_v3, %v2109_v28  ;;  %v1595_v6 = vpop.f32.mrb[10].mxu0 }
 0x122   : > { %v571_v7 = vmul.f32 %v2112_v29, %v519_v2  ;;  %v522_v8 = vadd.f32 %v1595_v6, %v2109_v28  ;;  %v513_v9 = vpop.f32.mrb[11].mxu0  ;;  %1620 = vmatprep.mubr.bf16.mxu1 %v595_v4  ;;  %vm551_vm9 = vcmp.gt.f32.partialorder %v519_v2, 0.0 }
 0x123   : > { %v569_v10 = vmul.f32 %v2112_v29, %v511_v5  ;;  %v514_v11 = vadd.f32 %v513_v9, %v2109_v28  ;;  %1621 = vmatmul.mubr.bf16.gmra.mrb[4].mxu1 %v596_v1  ;;  %vm549_vm10 = vcmp.gt.f32.partialorder %v511_v5, 0.0 }
 0x124   : > { %vm552_vm11 = vcmp.gt.f32.partialorder %v522_v8, 0.0  ;;  %v572_v12 = vmul.f32 %v2112_v29, %v522_v8  ;;  %v587_v14 = vsel %vm551_vm9, %v519_v2, %v571_v7 }
 0x125   : > { %vm550_vm12 = vcmp.gt.f32.partialorder %v514_v11, 0.0  ;;  %v570_v13 = vmul.f32 %v2112_v29, %v514_v11  ;;  %v585_v17 = vsel %vm549_vm10, %v511_v5, %v569_v10 }
 0x126   : > { %v588_v15 = vsel %vm552_vm11, %v522_v8, %v572_v12 }
 0x127   : > { %v1598_v16 = vpop.f32.mrb[12].mxu0  ;;  %v586_v18 = vsel %vm550_vm12, %v514_v11, %v570_v13  ;;  %v598_v19 = vpack.c.bf16 %v588_v15, %v587_v14 }
 0x128   : > { %v535_v20 = vadd.f32 %v1598_v16, %v2109_v28  ;;  %v526_v21 = vpop.f32.mrb[13].mxu0  ;;  %v597_v22 = vpack.c.bf16 %v586_v18, %v585_v17 }
 0x129   : > { %v527_v23 = vadd.f32 %v526_v21, %v2109_v28  ;;  %v1599_v24 = vpop.f32.mrb[14].mxu0 }
 0x12a   : > { %v575_v26 = vmul.f32 %v2112_v29, %v535_v20  ;;  %v538_v30 = vadd.f32 %v1599_v24, %v2109_v28  ;;  %v529_v31 = vpop.f32.mrb[15].mxu0  ;;  %1624 = vmatprep.mubr.bf16.mxu1 %v597_v22  ;;  %vm555_vm13 = vcmp.gt.f32.partialorder %v535_v20, 0.0 }
 0x12b   : > { %v573_v32 = vmul.f32 %v2112_v29, %v527_v23  ;;  %v530_v33 = vadd.f32 %v529_v31, %v2109_v28  ;;  %1625 = vmatmul.mubr.bf16.gmra.mrb[8].mxu1 %v598_v19  ;;  %vm553_vm14 = vcmp.gt.f32.partialorder %v527_v23, 0.0  ;;  %v1789_v28 = vld [vmem:[%s2331_s5 + $0x30] sm:$0xff]  }
 0x12c   : > { %vm556_vm15 = vcmp.gt.f32.partialorder %v538_v30, 0.0  ;;  %v576_v34 = vmul.f32 %v2112_v29, %v538_v30  ;;  %v591_v36 = vsel %vm555_vm13, %v535_v20, %v575_v26  ;;  %1644 = vmatprep.subr.bf16.mxu0 %v1789_v28 }
 0x12d   : > { %vm554_vm0 = vcmp.gt.f32.partialorder %v530_v33, 0.0  ;;  %v574_v35 = vmul.f32 %v2112_v29, %v530_v33  ;;  %v589_v38 = vsel %vm553_vm14, %v527_v23, %v573_v32  ;;  %1645 = vmatpush3.bf16.msra.mxu0 %v1789_v28  ;;  %v1791_v29 = vld [vmem:[#allocation2] sm:$0xff]  }
 0x12e   : > { %v592_v37 = vsel %vm556_vm15, %v538_v30, %v576_v34  ;;  %1646 = vmatprep.subr.bf16.mxu0 %v1790_v42  ;;  %1696 = vmatprep.subr.bf16.mxu1 %v1791_v29 }
 0x12f   : > { %v590_v39 = vsel %vm554_vm0, %v530_v33, %v574_v35  ;;  %v600_v40 = vpack.c.bf16 %v592_v37, %v591_v36  ;;  %1704 = vmatpush3.bf16.msra.mxu1 %v1791_v29 }
 0x130   : > { %v599_v41 = vpack.c.bf16 %v590_v39, %v589_v38  ;;  %1697 = vmatprep.subr.bf16.mxu1 %v2152_v43 }
 0x131   : > { %1647 = vmatpush3.bf16.msra.mxu0 %v1790_v42 }
 0x132   : > { %1628 = vmatprep.mubr.bf16.mxu1 %v599_v41  ;;  %1664 = vmatprep.subr.bf16.mxu0 %v1791_v29 }
 0x133   : > { %1629 = vmatmul.mubr.bf16.gmra.mrb[12].mxu1 %v600_v40 }
 0x134   : > { %1705 = vmatpush3.bf16.msra.mxu1 %v2152_v43 }
 0x135   : > { %1698 = vmatprep.subr.bf16.mxu1 %v2155_v44 }
 0x138   : > { %1706 = vmatpush3.bf16.msra.mxu1 %v2155_v44 }
 0x139   : > { %1699 = vmatprep.subr.bf16.mxu1 %v2159_v45 }
 0x13c   : > { %1707 = vmatpush3.bf16.msra.mxu1 %v2159_v45 }
 0x13d   : > { %1700 = vmatprep.subr.bf16.mxu1 %v2163_v46 }
 0x140   : > { %1708 = vmatpush3.bf16.msra.mxu1 %v2163_v46 }
 0x1ee   : > { %v1618_v50 = vpop.f32.mrb[0].mxu1 }
 0x1ef   : > { %v713_v51 = vadd.f32 %v1618_v50, %v2172_v48  ;;  %v704_v52 = vpop.f32.mrb[1].mxu1 }
 0x1f0   : > { %v705_v53 = vadd.f32 %v704_v52, %v2172_v48  ;;  %v1619_v54 = vpop.f32.mrb[2].mxu1 }
 0x1f1   : > { %v789_v55 = vmul.f32 %v2175_v49, %v713_v51  ;;  %v716_v56 = vadd.f32 %v1619_v54, %v2172_v48  ;;  %v707_v57 = vpop.f32.mrb[3].mxu1  ;;  %vm769_vm1 = vcmp.gt.f32.partialorder %v713_v51, 0.0 }
 0x1f2   : > { %v787_v58 = vmul.f32 %v2175_v49, %v705_v53  ;;  %v708_v59 = vadd.f32 %v707_v57, %v2172_v48  ;;  %vm767_vm2 = vcmp.gt.f32.partialorder %v705_v53, 0.0 }
 0x1f3   : > { %vm770_vm3 = vcmp.gt.f32.partialorder %v716_v56, 0.0  ;;  %v790_v60 = vmul.f32 %v2175_v49, %v716_v56  ;;  %v805_v62 = vsel %vm769_vm1, %v713_v51, %v789_v55 }
 0x1f4   : > { %vm768_vm4 = vcmp.gt.f32.partialorder %v708_v59, 0.0  ;;  %v788_v61 = vmul.f32 %v2175_v49, %v708_v59  ;;  %v803_v2 = vsel %vm767_vm2, %v705_v53, %v787_v58 }
 0x1f5   : > { %v806_v63 = vsel %vm770_vm3, %v716_v56, %v790_v60 }
 0x1f6   : > { %v820_v0 = vpack.c.bf16 %v806_v63, %v805_v62  ;;  %v1622_v1 = vpop.f32.mrb[4].mxu1  ;;  %v804_v3 = vsel %vm768_vm4, %v708_v59, %v788_v61  ;;  %v1796_v63 = vld [vmem:[#allocation2 + $0x28] sm:$0xff]  }
 0x1f7   : > { %v729_v4 = vadd.f32 %v1622_v1, %v2172_v48  ;;  %v720_v5 = vpop.f32.mrb[5].mxu1  ;;  %v819_v6 = vpack.c.bf16 %v804_v3, %v803_v2  ;;  %1701 = vmatprep.subr.bf16.mxu1 %v1796_v63 }
 0x1f8   : > { %v721_v7 = vadd.f32 %v720_v5, %v2172_v48  ;;  %v1623_v8 = vpop.f32.mrb[6].mxu1  ;;  %1709 = vmatpush3.bf16.msra.mxu1 %v1796_v63 }
 0x1f9   : > { %v793_v9 = vmul.f32 %v2175_v49, %v729_v4  ;;  %v732_v10 = vadd.f32 %v1623_v8, %v2172_v48  ;;  %v723_v11 = vpop.f32.mrb[7].mxu1  ;;  %1648 = vmatprep.mubr.bf16.mxu0 %v819_v6  ;;  %vm773_vm5 = vcmp.gt.f32.partialorder %v729_v4, 0.0 }
 0x1fa   : > { %v791_v12 = vmul.f32 %v2175_v49, %v721_v7  ;;  %v724_v13 = vadd.f32 %v723_v11, %v2172_v48  ;;  %1649 = vmatmul.mubr.bf16.vlgmr.msra.gmra.mrb[16].mxu0 %v820_v0  ;;  %vm771_vm6 = vcmp.gt.f32.partialorder %v721_v7, 0.0 }
 0x1fb   : > { %vm774_vm7 = vcmp.gt.f32.partialorder %v732_v10, 0.0  ;;  %v794_v14 = vmul.f32 %v2175_v49, %v732_v10  ;;  %1665 = vmatpush3.bf16.msra.mxu0 %v1791_v29  ;;  %v809_v16 = vsel %vm773_vm5, %v729_v4, %v793_v9 }
 0x1fc   : > { %vm772_vm8 = vcmp.gt.f32.partialorder %v724_v13, 0.0  ;;  %v792_v15 = vmul.f32 %v2175_v49, %v724_v13  ;;  %1666 = vmatprep.subr.bf16.mxu0 %v2152_v43  ;;  %v807_v19 = vsel %vm771_vm6, %v721_v7, %v791_v12 }
 0x1fd   : > { %v810_v17 = vsel %vm774_vm7, %v732_v10, %v794_v14 }
 0x1fe   : > { %v1626_v18 = vpop.f32.mrb[8].mxu1  ;;  %v808_v20 = vsel %vm772_vm8, %v724_v13, %v792_v15  ;;  %v822_v21 = vpack.c.bf16 %v810_v17, %v809_v16 }
 0x1ff   : > { %v745_v22 = vadd.f32 %v1626_v18, %v2172_v48  ;;  %v736_v23 = vpop.f32.mrb[9].mxu1  ;;  %v821_v24 = vpack.c.bf16 %v808_v20, %v807_v19  ;;  %1667 = vmatpush3.bf16.msra.mxu0 %v2152_v43 }
 0x200   : > { %v737_v26 = vadd.f32 %v736_v23, %v2172_v48  ;;  %v1627_v30 = vpop.f32.mrb[10].mxu1  ;;  %1668 = vmatprep.subr.bf16.mxu0 %v2155_v44 }
 0x201   : > { %v797_v31 = vmul.f32 %v2175_v49, %v745_v22  ;;  %v748_v32 = vadd.f32 %v1627_v30, %v2172_v48  ;;  %v739_v33 = vpop.f32.mrb[11].mxu1  ;;  %1652 = vmatprep.mubr.bf16.mxu0 %v821_v24  ;;  %vm777_vm9 = vcmp.gt.f32.partialorder %v745_v22, 0.0 }
 0x202   : > { %v795_v34 = vmul.f32 %v2175_v49, %v737_v26  ;;  %v740_v35 = vadd.f32 %v739_v33, %v2172_v48  ;;  %1653 = vmatmul.mubr.bf16.gmra.mrb[20].mxu0 %v822_v21  ;;  %vm775_vm10 = vcmp.gt.f32.partialorder %v737_v26, 0.0 }
 0x203   : > { %vm778_vm11 = vcmp.gt.f32.partialorder %v748_v32, 0.0  ;;  %v798_v36 = vmul.f32 %v2175_v49, %v748_v32  ;;  %1669 = vmatpush3.bf16.msra.mxu0 %v2155_v44  ;;  %v813_v38 = vsel %vm777_vm9, %v745_v22, %v797_v31 }
 0x204   : > { %vm776_vm12 = vcmp.gt.f32.partialorder %v740_v35, 0.0  ;;  %v796_v37 = vmul.f32 %v2175_v49, %v740_v35  ;;  %1670 = vmatprep.subr.bf16.mxu0 %v2159_v45  ;;  %v811_v41 = vsel %vm775_vm10, %v737_v26, %v795_v34 }
 0x205   : > { %v814_v39 = vsel %vm778_vm11, %v748_v32, %v798_v36 }
 0x206   : > { %v1630_v40 = vpop.f32.mrb[12].mxu1  ;;  %v812_v28 = vsel %vm776_vm12, %v740_v35, %v796_v37  ;;  %v824_v42 = vpack.c.bf16 %v814_v39, %v813_v38 }
 0x207   : > { %v761_v29 = vadd.f32 %v1630_v40, %v2172_v48  ;;  %v752_v43 = vpop.f32.mrb[13].mxu1  ;;  %v823_v47 = vpack.c.bf16 %v812_v28, %v811_v41  ;;  %1671 = vmatpush3.bf16.msra.mxu0 %v2159_v45 }
 0x208   : > { %v753_v50 = vadd.f32 %v752_v43, %v2172_v48  ;;  %v1631_v44 = vpop.f32.mrb[14].mxu1  ;;  %1672 = vmatprep.subr.bf16.mxu0 %v2163_v46 }
 0x209   : > { %v801_v51 = vmul.f32 %v2175_v49, %v761_v29  ;;  %v764_v52 = vadd.f32 %v1631_v44, %v2172_v48  ;;  %v755_v53 = vpop.f32.mrb[15].mxu1  ;;  %1656 = vmatprep.mubr.bf16.mxu0 %v823_v47  ;;  %vm781_vm13 = vcmp.gt.f32.partialorder %v761_v29, 0.0 }
 0x20a   : > { %v799_v54 = vmul.f32 %v2175_v49, %v753_v50  ;;  %v756_v55 = vadd.f32 %v755_v53, %v2172_v48  ;;  %1657 = vmatmul.mubr.bf16.gmra.mrb[24].mxu0 %v824_v42  ;;  %vm779_vm14 = vcmp.gt.f32.partialorder %v753_v50, 0.0  ;;  %v1797_v48 = vld [vmem:[#allocation2 + $0x30] sm:$0xff]  }
 0x20b   : > { %vm782_vm15 = vcmp.gt.f32.partialorder %v764_v52, 0.0  ;;  %v802_v45 = vmul.f32 %v2175_v49, %v764_v52  ;;  %1673 = vmatpush3.bf16.msra.mxu0 %v2163_v46  ;;  %v817_v57 = vsel %vm781_vm13, %v761_v29, %v801_v51  ;;  %1702 = vmatprep.subr.bf16.mxu1 %v1797_v48  ;;  %v1798_v46 = vld [vmem:[#allocation2 + $0x38] sm:$0xff]  }
 0x20c   : > { %vm780_vm0 = vcmp.gt.f32.partialorder %v756_v55, 0.0  ;;  %v800_v56 = vmul.f32 %v2175_v49, %v756_v55  ;;  %v815_v59 = vsel %vm779_vm14, %v753_v50, %v799_v54  ;;  %1674 = vmatprep.subr.bf16.mxu0 %v1796_v63  ;;  %1710 = vmatpush3.bf16.msra.mxu1 %v1797_v48  ;;  %v843_v49 = vld [vmem:[%s2332_s6] sm:$0x3] }
 0x20d   : > { %v818_v58 = vsel %vm782_vm15, %v764_v52, %v802_v45  ;;  %1703 = vmatprep.subr.bf16.mxu1 %v1798_v46  ;;  %v2221_v0 = vrot.slane %v843_v49, %v2101_v25  ;;  %v2224_v1 = vrot.slane %v843_v49, %v2106_v27 }
 0x20e   : > { %v816_v60 = vsel %vm780_vm0, %v756_v55, %v800_v56  ;;  %v826_v61 = vpack.c.bf16 %v818_v58, %v817_v57 }
 0x20f   : > { %v825_v62 = vpack.c.bf16 %v816_v60, %v815_v59  ;;  %1675 = vmatpush3.bf16.msra.mxu0 %v1796_v63 }
 0x210   : > { %1676 = vmatprep.subr.bf16.mxu0 %v1797_v48  ;;  %1711 = vmatpush3.bf16.msra.mxu1 %v1798_v46 }
 0x211   : > { %1660 = vmatprep.mubr.bf16.mxu0 %v825_v62 }
 0x212   : > { %1661 = vmatmul.mubr.bf16.gmra.mrb[28].mxu0 %v826_v61 }
 0x213   : > { %1677 = vmatpush3.bf16.msra.mxu0 %v1797_v48 }
 0x214   : > { %1678 = vmatprep.subr.bf16.mxu0 %v1798_v46 }
 0x217   : > { %1679 = vmatpush3.bf16.msra.mxu0 %v1798_v46 }
 0x2cd   : > { %v1650_v2 = vpop.f32.mrb[16].mxu0 }
 0x2ce   : > { %v939_v3 = vadd.f32 %v1650_v2, %v2221_v0  ;;  %v930_v4 = vpop.f32.mrb[17].mxu0 }
 0x2cf   : > { %v931_v5 = vadd.f32 %v930_v4, %v2221_v0  ;;  %v1651_v6 = vpop.f32.mrb[18].mxu0 }
 0x2d0   : > { %v1015_v7 = vmul.f32 %v2224_v1, %v939_v3  ;;  %v942_v8 = vadd.f32 %v1651_v6, %v2221_v0  ;;  %v933_v9 = vpop.f32.mrb[19].mxu0  ;;  %vm995_vm1 = vcmp.gt.f32.partialorder %v939_v3, 0.0 }
 0x2d1   : > { %v1013_v10 = vmul.f32 %v2224_v1, %v931_v5  ;;  %v934_v25 = vadd.f32 %v933_v9, %v2221_v0  ;;  %vm993_vm2 = vcmp.gt.f32.partialorder %v931_v5, 0.0 }
 0x2d2   : > { %vm996_vm3 = vcmp.gt.f32.partialorder %v942_v8, 0.0  ;;  %v1016_v27 = vmul.f32 %v2224_v1, %v942_v8  ;;  %v1031_v12 = vsel %vm995_vm1, %v939_v3, %v1015_v7 }
 0x2d3   : > { %vm994_vm4 = vcmp.gt.f32.partialorder %v934_v25, 0.0  ;;  %v1014_v11 = vmul.f32 %v2224_v1, %v934_v25  ;;  %v1029_v16 = vsel %vm993_vm2, %v931_v5, %v1013_v10 }
 0x2d4   : > { %v1032_v13 = vsel %vm996_vm3, %v942_v8, %v1016_v27 }
 0x2d5   : > { %v1046_v14 = vpack.c.bf16 %v1032_v13, %v1031_v12  ;;  %v1654_v15 = vpop.f32.mrb[20].mxu0  ;;  %v1030_v17 = vsel %vm994_vm4, %v934_v25, %v1014_v11 }
 0x2d6   : > { %v955_v18 = vadd.f32 %v1654_v15, %v2221_v0  ;;  %v946_v19 = vpop.f32.mrb[21].mxu0  ;;  %v1045_v20 = vpack.c.bf16 %v1030_v17, %v1029_v16 }
 0x2d7   : > { %v947_v21 = vadd.f32 %v946_v19, %v2221_v0  ;;  %v1655_v22 = vpop.f32.mrb[22].mxu0 }
 0x2d8   : > { %v1019_v23 = vmul.f32 %v2224_v1, %v955_v18  ;;  %v958_v24 = vadd.f32 %v1655_v22, %v2221_v0  ;;  %v949_v26 = vpop.f32.mrb[23].mxu0  ;;  %1680 = vmatprep.mubr.bf16.mxu0 %v1045_v20  ;;  %vm999_vm5 = vcmp.gt.f32.partialorder %v955_v18, 0.0 }
 0x2d9   : > { %v1017_v30 = vmul.f32 %v2224_v1, %v947_v21  ;;  %v950_v31 = vadd.f32 %v949_v26, %v2221_v0  ;;  %1681 = vmatmul.mubr.bf16.vlgmr.msra.gmra.mrb[32].mxu0 %v1046_v14  ;;  %vm997_vm6 = vcmp.gt.f32.partialorder %v947_v21, 0.0 }
 0x2da   : > { %vm1000_vm7 = vcmp.gt.f32.partialorder %v958_v24, 0.0  ;;  %v1020_v32 = vmul.f32 %v2224_v1, %v958_v24  ;;  %v1035_v34 = vsel %vm999_vm5, %v955_v18, %v1019_v23 }
 0x2db   : > { %vm998_vm8 = vcmp.gt.f32.partialorder %v950_v31, 0.0  ;;  %v1018_v33 = vmul.f32 %v2224_v1, %v950_v31  ;;  %v1033_v38 = vsel %vm997_vm6, %v947_v21, %v1017_v30 }
 0x2dc   : > { %v1036_v35 = vsel %vm1000_vm7, %v958_v24, %v1020_v32 }
 0x2dd   : > { %v1048_v36 = vpack.c.bf16 %v1036_v35, %v1035_v34  ;;  %v1658_v37 = vpop.f32.mrb[24].mxu0  ;;  %v1034_v39 = vsel %vm998_vm8, %v950_v31, %v1018_v33 }
 0x2de   : > { %v971_v40 = vadd.f32 %v1658_v37, %v2221_v0  ;;  %v962_v41 = vpop.f32.mrb[25].mxu0  ;;  %v1047_v28 = vpack.c.bf16 %v1034_v39, %v1033_v38 }
 0x2df   : > { %v963_v42 = vadd.f32 %v962_v41, %v2221_v0  ;;  %v1659_v29 = vpop.f32.mrb[26].mxu0 }
 0x2e0   : > { %v1023_v43 = vmul.f32 %v2224_v1, %v971_v40  ;;  %v974_v47 = vadd.f32 %v1659_v29, %v2221_v0  ;;  %v965_v50 = vpop.f32.mrb[27].mxu0  ;;  %1684 = vmatprep.mubr.bf16.mxu1 %v1047_v28  ;;  %vm1003_vm9 = vcmp.gt.f32.partialorder %v971_v40, 0.0 }
 0x2e1   : > { %v1021_v44 = vmul.f32 %v2224_v1, %v963_v42  ;;  %v966_v51 = vadd.f32 %v965_v50, %v2221_v0  ;;  %1685 = vmatmul.mubr.bf16.vlgmr.msra.gmra.mrb[16].mxu1 %v1048_v36  ;;  %vm1001_vm10 = vcmp.gt.f32.partialorder %v963_v42, 0.0 }
 0x2e2   : > { %vm1004_vm11 = vcmp.gt.f32.partialorder %v974_v47, 0.0  ;;  %v1024_v52 = vmul.f32 %v2224_v1, %v974_v47  ;;  %v1039_v54 = vsel %vm1003_vm9, %v971_v40, %v1023_v43 }
 0x2e3   : > { %vm1002_vm12 = vcmp.gt.f32.partialorder %v966_v51, 0.0  ;;  %v1022_v53 = vmul.f32 %v2224_v1, %v966_v51  ;;  %v1037_v56 = vsel %vm1001_vm10, %v963_v42, %v1021_v44 }
 0x2e4   : > { %v1040_v55 = vsel %vm1004_vm11, %v974_v47, %v1024_v52 }
 0x2e5   : > { %v1662_v45 = vpop.f32.mrb[28].mxu0  ;;  %v1038_v57 = vsel %vm1002_vm12, %v966_v51, %v1022_v53  ;;  %v1050_v58 = vpack.c.bf16 %v1040_v55, %v1039_v54 }
 0x2e6   : > { %v987_v59 = vadd.f32 %v1662_v45, %v2221_v0  ;;  %v978_v60 = vpop.f32.mrb[29].mxu0  ;;  %v1049_v61 = vpack.c.bf16 %v1038_v57, %v1037_v56 }
 0x2e7   : > { %v979_v62 = vadd.f32 %v978_v60, %v2221_v0  ;;  %v1663_v63 = vpop.f32.mrb[30].mxu0 }
 0x2e8   : > { %v1027_v48 = vmul.f32 %v2224_v1, %v987_v59  ;;  %v990_v46 = vadd.f32 %v1663_v63, %v2221_v0  ;;  %v981_v49 = vpop.f32.mrb[31].mxu0  ;;  %1688 = vmatprep.mubr.bf16.mxu1 %v1049_v61  ;;  %vm1007_vm13 = vcmp.gt.f32.partialorder %v987_v59, 0.0 }
 0x2e9   : > { %v1025_v2 = vmul.f32 %v2224_v1, %v979_v62  ;;  %v982_v3 = vadd.f32 %v981_v49, %v2221_v0  ;;  %1689 = vmatmul.mubr.bf16.gmra.mrb[20].mxu1 %v1050_v58  ;;  %vm1005_vm14 = vcmp.gt.f32.partialorder %v979_v62, 0.0  ;;  %v1431_v0 = vld [vmem:[%s2334_s8] ss:$0 sm:$0xff] }
 0x2ea   : > { %vm1008_vm15 = vcmp.gt.f32.partialorder %v990_v46, 0.0  ;;  %v1028_v4 = vmul.f32 %v2224_v1, %v990_v46  ;;  %v1043_v6 = vsel %vm1007_vm13, %v987_v59, %v1027_v48 }
 0x2eb   : > { %vm1006_vm0 = vcmp.gt.f32.partialorder %v982_v3, 0.0  ;;  %v1026_v5 = vmul.f32 %v2224_v1, %v982_v3  ;;  %v1041_v8 = vsel %vm1005_vm14, %v979_v62, %v1025_v2 }
 0x2ec   : > { %v1044_v7 = vsel %vm1008_vm15, %v990_v46, %v1028_v4 }
 0x2ed   : > { %v1042_v9 = vsel %vm1006_vm0, %v982_v3, %v1026_v5  ;;  %v1052_v10 = vpack.c.bf16 %v1044_v7, %v1043_v6 }
 0x2ee   : > { %v1051_v25 = vpack.c.bf16 %v1042_v9, %v1041_v8 }
 0x2f0   : > { %1692 = vmatprep.mubr.bf16.mxu1 %v1051_v25 }
 0x2f1   : > { %1693 = vmatmul.mubr.bf16.gmra.mrb[24].mxu1 %v1052_v10 }
 0x3ac   : > { %v1682_v27 = vpop.f32.mrb[32].mxu0 }
 0x3ad   : > { %v1158_v11 = vpop.f32.mrb[33].mxu0  ;;  %v1167_v13 = vadd.f32 %v1682_v27, %v1431_v0 }
 0x3ae   : > { %v1683_v12 = vpop.f32.mrb[34].mxu0  ;;  %v1159_v15 = vadd.f32 %v1431_v0, %v1158_v11 }
 0x3af   : > { %v1170_v1 = vadd.f32 %v1683_v12, %v1431_v0  ;;  %v1161_v14 = vpop.f32.mrb[35].mxu0 }
 0x3b0   : > { %v1162_v16 = vadd.f32 %v1431_v0, %v1161_v14 }
 0x3b1   : > { %v1486_v17 = vpack.c.bf16 %v1170_v1, %v1167_v13 }
 0x3b2   : > { %v1481_v18 = vpack.c.bf16 %v1162_v16, %v1159_v15 }
 0x3b3   : > { %1518 = vst [vmem:[%s2264_s29 + $0x8] sm:$0xff] %v1486_v17  }
 0x3b4   : > { %1482 = vst [vmem:[%s2264_s29] sm:$0xff] %v1481_v18   ;;  %v1686_v19 = vpop.f32.mrb[16].mxu1 }
 0x3b5   : > { %v1174_v20 = vpop.f32.mrb[17].mxu1  ;;  %v1183_v22 = vadd.f32 %v1686_v19, %v1431_v0 }
 0x3b6   : > { %v1687_v21 = vpop.f32.mrb[18].mxu1  ;;  %v1175_v26 = vadd.f32 %v1431_v0, %v1174_v20 }
 0x3b7   : > { %v1186_v23 = vadd.f32 %v1687_v21, %v1431_v0  ;;  %v1177_v24 = vpop.f32.mrb[19].mxu1 }
 0x3b8   : > { %v1178_v30 = vadd.f32 %v1431_v0, %v1177_v24 }
 0x3b9   : > { %v1496_v31 = vpack.c.bf16 %v1186_v23, %v1183_v22 }
 0x3ba   : > { %v1491_v32 = vpack.c.bf16 %v1178_v30, %v1175_v26 }
 0x3bb   : > { %1520 = vst [vmem:[%s2264_s29 + $0x18] sm:$0xff] %v1496_v31  }
 0x3bc   : > { %1519 = vst [vmem:[%s2264_s29 + $0x10] sm:$0xff] %v1491_v32   ;;  %v1690_v33 = vpop.f32.mrb[20].mxu1 }
 0x3bd   : > { %v1190_v34 = vpop.f32.mrb[21].mxu1  ;;  %v1199_v36 = vadd.f32 %v1690_v33, %v1431_v0 }
 0x3be   : > { %v1691_v35 = vpop.f32.mrb[22].mxu1  ;;  %v1191_v39 = vadd.f32 %v1431_v0, %v1190_v34 }
 0x3bf   : > { %v1202_v37 = vadd.f32 %v1691_v35, %v1431_v0  ;;  %v1193_v38 = vpop.f32.mrb[23].mxu1 }
 0x3c0   : > { %v1194_v40 = vadd.f32 %v1431_v0, %v1193_v38 }
 0x3c1   : > { %v1506_v41 = vpack.c.bf16 %v1202_v37, %v1199_v36 }
 0x3c2   : > { %v1501_v28 = vpack.c.bf16 %v1194_v40, %v1191_v39 }
 0x3c3   : > { %1522 = vst [vmem:[%s2264_s29 + $0x28] sm:$0xff] %v1506_v41  }
 0x3c4   : > { %1521 = vst [vmem:[%s2264_s29 + $0x20] sm:$0xff] %v1501_v28   ;;  %v1694_v42 = vpop.f32.mrb[24].mxu1 }
 0x3c5   : > { %v1206_v29 = vpop.f32.mrb[25].mxu1  ;;  %v1215_v47 = vadd.f32 %v1694_v42, %v1431_v0 }
 0x3c6   : > { %v1695_v43 = vpop.f32.mrb[26].mxu1  ;;  %v1207_v51 = vadd.f32 %v1431_v0, %v1206_v29 }
 0x3c7   : > { %v1218_v50 = vadd.f32 %v1695_v43, %v1431_v0  ;;  %v1209_v44 = vpop.f32.mrb[27].mxu1 }
 0x3c8   : > { %v1210_v52 = vadd.f32 %v1431_v0, %v1209_v44 }
 0x3c9   : > { %v1516_v53 = vpack.c.bf16 %v1218_v50, %v1215_v47 }
 0x3ca   : > { %v1511_v54 = vpack.c.bf16 %v1210_v52, %v1207_v51 }
 0x3cb   : > { %1524 = vst [vmem:[%s2264_s29 + $0x38] sm:$0xff] %v1516_v53  }
 0x3cc   : > { %1523 = vst [vmem:[%s2264_s29 + $0x30] sm:$0xff] %v1511_v54  }
 0x3cd   : > { %1840 = shalt.err (!%p1837_p7)
}
 0x3ce   : > { %s1841_s26 = scalar_lea.hbm %s2279_s21, 1024  ;;  %s1845_s24 = scalar_lea.hbm %s2335_s9, 2048 }
 0x3cf   : > { %p1842_p8 = scmp.ne.s32.totalorder %s2279_s21, %s1841_s26  ;;  %p1846_p1 = scmp.lt.u32.totalorder %s2279_s21, %s2335_s9 }
 0x3d0   : > { %p1847_p0 = scmp.lt.u32.totalorder %s1845_s24, %s1841_s26  ;;  %p1849_p6 = scmp.lt.u32.totalorder %s1841_s26, %s2279_s21 }
 0x3d1   : > { %p1843_p11 = pnand %p1842_p8, %p2346_p9 }
 0x3d2   : > { %p1848_p5 = por %p1847_p0, %p1846_p1 }
 0x3d3   : > { %p1844_p13 = pneg %p1843_p11 }
 0x3d4   : > { %p1850_p10 = por %p1849_p6, %p1848_p5 }
 0x3d6   : > { %p1851_p12 = pnand %p1850_p10, %p1844_p13 }
 0x3d8   : > { %1854 = shalt.err (!%p1851_p12)
}
 0x3d9   : > { %s1899_s22 = smov 64   ;;  %s1900_s25 = smov 4  }
 0x3da   : > { %1716 = dma.vmem_to_hbm [thread:$0]  (%p2346_p9), %s2274_s14, 1024, %s2279_s21, %s2285_s13, %s1899_s22, %s1899_s22, %s1900_s25  }
 0x3db PF: > { %p1728_p2 = scmp.ge.s32.totalorder %s1893_s12, 2  ;;  %s1330_s28 = sand.u32 1, %s1881_s30  }
 0x3dc   : > { %p2347_p3 = scmp.ne.s32.totalorder %s2340_s20, 0  ;;  %s1331_s16 = scalar_lea.sflag [#allocation4], %s1330_s28 }
 0x3de   : > { %p1723_p4 = pnand %p1728_p2, %p2347_p3 }
 0x3e0   : > { %1876 = dma.done.wait (!%p1723_p4), %s1331_s16, 1024  }
 0x3e1   : > { %1878 = vsyncadd (!%p1723_p4), %s1331_s16, 4294966272  ;;  %p20_p7 = scmp.ge.s32.totalorder %s1976_s15, 4   ;;  %s2348_s30 = smov %s1885_s10 }
 0x3e2   : > { %s2349_s10 = smov %s1889_s11  ;;  %s2350_s11 = smov %s1987_s18 }
 0x3e3   : > { %s2351_s12 = smov %s1976_s15  ;;  %22 = sbr.rel (!%p20_p7) target bundleno = 4 (0x4), region = 96 }
 0x3ea   :  { %1336 = vsyncpa [#allocation3], 1 }
 0x3eb   :  { %1338 = vsyncpa [#allocation3 + $0x1], 1 }
 0x3ec   :  { %1339 = vsyncpa [#allocation4], 1 }
 0x3ed   :  { %1341 = vsyncpa [#allocation4 + $0x1], 1 }

// kernel: tpu_custom_call.1
= control target key start
LH: loop header
LB: loop body
LE: loop exit
PB: predicated region body
PF: predicated region fallthrough
CT: control target
= control target key end

     0   :  { %14 = vsyncpa [#allocation3], 0  ;;  %s2326_s0 = inlined_call_operand.vmem [shape: bf16[256,16], index: 0, kind: input, shape index: {}]   ;;  %s2327_s1 = inlined_call_operand.vmem [shape: bf16[16,128], index: 1, kind: input, shape index: {}]   ;;  %s2328_s2 = inlined_call_operand.vmem [shape: f32[2,128], index: 2, kind: input, shape index: {}]   ;;  %s2329_s3 = inlined_call_operand.vmem [shape: bf16[128,128], index: 3, kind: input, shape index: {}]   ;;  %s2330_s4 = inlined_call_operand.vmem [shape: f32[2,128], index: 4, kind: input, shape index: {}]   ;;  %s2331_s5 = inlined_call_operand.vmem [shape: bf16[128,128], index: 5, kind: input, shape index: {}]   ;;  %s2332_s6 = inlined_call_operand.vmem [shape: f32[2,128], index: 6, kind: input, shape index: {}]   ;;  %s2333_s7 = inlined_call_operand.hbm [shape: bf16[128,128], index: 7, kind: input, shape index: {}]   ;;  %s2334_s8 = inlined_call_operand.vmem [shape: f32[1,128], index: 8, kind: input, shape index: {}]   ;;  %s2335_s9 = inlined_call_operand.hbm [shape: bf16[256,128], index: 9, kind: output, shape index: {}]  }
   0x1   :  { %15 = vsyncpa [#allocation4], 0 }
   0x2   :  { %17 = vsyncpa [#allocation4 + $0x1], 0  ;;  %s1951_s30 = smov 0   ;;  %s1953_s10 = smov 0  }
   0x3   :  { %s1955_s11 = smov 0   ;;  %s1957_s12 = smov 0  }
   0x4 LB: > { %s1972_s13 = sadd.s32 4294967295, %s1893_s12   ;;  %s1389_s14 = sadd.s32 4294967294, %s1893_s12   ;;  %s1893_s12 = sphi %s1957_s12, %s2351_s12   ;;  %s1889_s11 = sphi %s1955_s11, %s2350_s11   ;;  %s1885_s10 = sphi %s1953_s10, %s2349_s10   ;;  %s1881_s30 = sphi %s1951_s30, %s2348_s30  }
   0x5   : > { %s1976_s15 = sadd.s32 1, %s1893_s12   ;;  %s224_s16 = sadd.s32 1, %s1889_s11 }
   0x6   : > { %s221_s17 = ssub.s32 %s1893_s12, %s1976_s15  ;;  %p234_p0 = scmp.ne.s32.totalorder %s1889_s11, %s1885_s10 }
   0x7   : > { %p222_p1 = scmp.eq.s32.totalorder %s221_s17, 0  ;;  %p235_p2 = scmp.eq.s32.totalorder %s1972_s13, 1 }
   0x8   : > { %p240_p3 = scmp.ne.s32.totalorder %s1885_s10, %s1881_s30  ;;  %p241_p4 = scmp.eq.s32.totalorder %s1389_s14, 1 }
   0x9   : > { %s1987_s18 = scalar_select %p222_p1, %s1889_s11, %s224_s16  }
   0xa   : > { %p1989_p5 = por %p235_p2, %p234_p0  ;;  %p1993_p6 = por %p241_p4, %p240_p3 }
   0xb   : > { %p1390_p7 = scmp.ge.s32.totalorder %s1893_s12, 1  ;;  %p248_p8 = scmp.lt.s32.totalorder %s1893_s12, 3 }
   0xc   : > { %s2339_s19 = scalar_select %p1989_p5, 1, 0 }
   0xd   : > { %s2340_s20 = scalar_select %p1993_p6, 1, 0 }
   0xe   : > { %p2336_p9 = scmp.eq.s32.totalorder %s1972_s13, 0  ;;  %p2000_p10 = pnand %p1390_p7, %p248_p8 }
   0xf   : > { %s1895_s22 = smov [#allocation2]   ;;  %s1799_s27 = scalar_lea.hbm %s2333_s7, 1024 }
  0x10   : > { %s2341_s21 = scalar_select %p2000_p10, 1, 0 }
  0x11   : > { %s278_s23 = sshll.u32 %s1895_s22, 4  ;;  %p1718_p11 = pneg %p2000_p10  ;;  %s279_s23 = int_to_ptr.vmem [resolvable:$true] %s278_s23 }
  0x12   : > { %p1800_p13 = scmp.ne.s32.totalorder %s2333_s7, %s1799_s27  ;;  %p1806_p3 = scmp.lt.u32.totalorder %s1799_s27, %s2333_s7 }
  0x13   : > { %p2008_p12 = pnand %p2336_p9, %p1718_p11 }
  0x15   : > { %p1801_p0 = pneg %p2008_p12 }
  0x17   : > { %p1802_p1 = pnand %p1801_p0, %p1800_p13 }
  0x19   : > { %p1803_p2 = pneg %p1802_p1 }
  0x1b   : > { %p1808_p4 = pnand %p1806_p3, %p1803_p2 }
  0x1d   : > { %1811 = shalt.err (!%p1808_p4)
}
  0x1e   : > { %s1812_s17 = scalar_lea.vmem %s279_s23, 1024  ;;  %p1820_p9 = scmp.lt.s32.totalorder %s279_s23, %s279_s23 }
  0x1f   : > { %p1813_p7 = scmp.ne.s32.totalorder %s279_s23, %s1812_s17  ;;  %p1821_p6 = scmp.lt.s32.totalorder %s1812_s17, %s1812_s17 }
  0x21   : > { %p1815_p8 = pnand %p1813_p7, %p1801_p0  ;;  %p1822_p5 = por %p1821_p6, %p1820_p9 }
  0x23   : > { %p1816_p11 = pneg %p1815_p8 }
  0x25   : > { %p1823_p10 = pnand %p1822_p5, %p1816_p11 }
  0x27   : > { %1826 = shalt.err (!%p1823_p10)
}
  0x28   : > { %s1896_s22 = smov 64   ;;  %s1897_s25 = smov 4  }
  0x29   : > { %1721 = dma.hbm_to_vmem [thread:$0]  (!%p2008_p12), %s2333_s7, 1024, %s279_s23, [#allocation3], %s1896_s22, %s1896_s22, %s1897_s25  }
  0x2a   : > { %p2343_p13 = scmp.ne.s32.totalorder %s2341_s21, 0 }
  0x2b   : > { %p2344_p1 = scmp.eq.s32.totalorder (!%p2343_p13), %s1972_s13, 0 }
  0x2c   : > { %306 = sbr.rel (%p2343_p13) target bundleno = 987 (0x3db), region = 56 }
  0x33   : > { %1872 = dma.done.wait (%p2344_p1), [#allocation3], 1024   ;;  %p2345_p0 = pmov %p2344_p1 }
  0x34   : > { %s1396_s27 = sshll.u32 %s1972_s13, 4  ;;  %v1766_v0 = vld [vmem:[%s2327_s1] sm:$0xff]   ;;  %vm419_vm0 = vcmask 130048   ;;  %v1776_v6 = vld [vmem:[%s2329_s3 + $0x8] sm:$0xff]   ;;  %v1777_v8 = vld [vmem:[%s2329_s3 + $0x10] sm:$0xff]   ;;  %v369_v23 = vlaneseq  ;;  %s339_s26 = sand.u32 1, %s1885_s10  }
  0x35   : > { %1874 = vsyncadd (%p2345_p0), [#allocation3], 4294966272  ;;  %p343_p5 = scmp.lt.s32.totalorder %s1396_s27, 31  ;;  %1582 = vmatprep.subr.bf16.mxu0 %v1766_v0  ;;  %v1775_v5 = vld [vmem:[%s2329_s3] sm:$0xff]   ;;  %v1778_v9 = vld [vmem:[%s2329_s3 + $0x18] sm:$0xff]   ;;  %s1477_s24 = sshll.u32 %s1972_s13, 10 }
  0x36   : > { %1583 = vmatpush3.bf16.msra.mxu0 %v1766_v0  ;;  %1600 = vmatprep.subr.bf16.mxu1 %v1775_v5  ;;  %v1779_v12 = vld [vmem:[%s2329_s3 + $0x20] sm:$0xff]   ;;  %v1780_v14 = vld [vmem:[%s2329_s3 + $0x28] sm:$0xff]   ;;  %v1781_v15 = vld [vmem:[%s2329_s3 + $0x30] sm:$0xff]   ;;  %v370_v24 = vshrl.u32 %v369_v23, 7  ;;  %s2279_s21 = scalar_lea.hbm %s2335_s9, %s1477_s24  ;;  %s2285_s13 = scalar_lea.sflag [#allocation4], %s339_s26 }
  0x37   : > { %s2353_s27 = smov (!%p343_p5, %s1396_s27), 31  ;;  %1601 = vmatpush3.bf16.msra.mxu1 %v1775_v5  ;;  %v1782_v16 = vld [vmem:[%s2329_s3 + $0x38] sm:$0xff]   ;;  %v1783_v17 = vld [vmem:[%s2331_s5] sm:$0xff]   ;;  %v1784_v18 = vld [vmem:[%s2331_s5 + $0x8] sm:$0xff]   ;;  %p2346_p9 = scmp.ne.s32.totalorder %s2339_s19, 0 }
  0x38   : > { %s1397_s29 = sshll.u32 %s2353_s27, 2  ;;  %1602 = vmatprep.subr.bf16.mxu1 %v1776_v6  ;;  %1632 = vmatprep.subr.bf16.mxu0 %v1783_v17  ;;  %v1785_v19 = vld [vmem:[%s2331_s5 + $0x10] sm:$0xff]   ;;  %v1786_v20 = vld [vmem:[%s2331_s5 + $0x18] sm:$0xff]   ;;  %v1787_v21 = vld [vmem:[%s2331_s5 + $0x20] sm:$0xff]   ;;  %v2101_v25 = vsub.s32 0, %v370_v24  ;;  %v2106_v27 = vsub.s32 1, %v370_v24 }
  0x39   : > { %s2038_s16 = scalar_lea.vmem %s2326_s0, %s1397_s29  ;;  %v1788_v22 = vld [vmem:[%s2331_s5 + $0x28] sm:$0xff]   ;;  %v368_v26 = vld [vmem:[%s2328_s2] sm:$0x3]  ;;  %s1395_s27 = sshll.u32 %s339_s26, 6 }
  0x3a   : > { %v1767_v1 = vld [vmem:[%s2038_s16] sm:$0xff]   ;;  %v1768_v2 = vld [vmem:[%s2038_s16 + $0x8] sm:$0xff]   ;;  %v1769_v3 = vld [vmem:[%s2038_s16 + $0x10] sm:$0xff]   ;;  %v2109_v28 = vrot.slane %v368_v26, %v2101_v25  ;;  %v2112_v29 = vrot.slane %v368_v26, %v2106_v27  ;;  %s2264_s29 = scalar_lea.vmem [#allocation5], %s1395_s27  ;;  %s1898_s25 = smov [#allocation5]  }
  0x3b   : > { %1584 = vmatprep.mubr.msk.bf16.mxu0 %vm419_vm0, %v1767_v1  ;;  %v1770_v4 = vld [vmem:[%s2038_s16 + $0x18] sm:$0xff]   ;;  %v1771_v7 = vld [vmem:[%s2038_s16 + $0x20] sm:$0xff]   ;;  %v1772_v10 = vld [vmem:[%s2038_s16 + $0x28] sm:$0xff]   ;;  %1603 = vmatpush3.bf16.msra.mxu1 %v1776_v6  ;;  %s1315_s14 = sshll.u32 %s2264_s29, 4  ;;  %s1831_s28 = sshll.u32 %s1898_s25, 4  ;;  %s2274_s14 = int_to_ptr.vmem [resolvable:$true] %s1315_s14  ;;  %s1832_s28 = int_to_ptr.vmem [resolvable:$false] %s1831_s28 }
  0x3c   : > { %1585 = vmatmul.mubr.msk.bf16.vlgmr.msra.gmra.mrb[0].mxu0 %vm419_vm0, %v1768_v2  ;;  %v1773_v11 = vld [vmem:[%s2038_s16 + $0x30] sm:$0xff]   ;;  %1604 = vmatprep.subr.bf16.mxu1 %v1777_v8  ;;  %v1774_v13 = vld [vmem:[%s2038_s16 + $0x38] sm:$0xff]   ;;  %s1827_s22 = scalar_lea.vmem %s2274_s14, 1024  ;;  %s1833_s16 = scalar_lea.vmem %s1832_s28, 2048 }
  0x3d   : > { %1588 = vmatprep.mubr.msk.bf16.mxu0 %vm419_vm0, %v1769_v3  ;;  %1633 = vmatpush3.bf16.msra.mxu0 %v1783_v17  ;;  %p1828_p6 = scmp.ne.s32.totalorder %s2274_s14, %s1827_s22  ;;  %p1834_p2 = scmp.lt.s32.totalorder %s2274_s14, %s1832_s28 }
  0x3e   : > { %1634 = vmatprep.subr.bf16.mxu0 %v1784_v18  ;;  %p1835_p3 = scmp.lt.s32.totalorder %s1833_s16, %s1827_s22 }
  0x3f   : > { %1605 = vmatpush3.bf16.msra.mxu1 %v1777_v8  ;;  %p1829_p10 = pnand %p1828_p6, %p2346_p9 }
  0x40   : > { %1606 = vmatprep.subr.bf16.mxu1 %v1778_v9  ;;  %p1836_p4 = por %p1835_p3, %p1834_p2 }
  0x41   : > { %1635 = vmatpush3.bf16.msra.mxu0 %v1784_v18  ;;  %p1830_p12 = pneg %p1829_p10 }
  0x42   : > { %1636 = vmatprep.subr.bf16.mxu0 %v1785_v19 }
  0x43   : > { %1607 = vmatpush3.bf16.msra.mxu1 %v1778_v9  ;;  %p1837_p7 = pnand %p1836_p4, %p1830_p12 }
  0x44   : > { %1589 = vmatmul.mubr.msk.bf16.gmra.mrb[4].mxu0 %vm419_vm0, %v1770_v4  ;;  %1608 = vmatprep.subr.bf16.mxu1 %v1779_v12 }
  0x45   : > { %1592 = vmatprep.mubr.msk.bf16.mxu0 %vm419_vm0, %v1771_v7  ;;  %1637 = vmatpush3.bf16.msra.mxu0 %v1785_v19 }
  0x46   : > { %1638 = vmatprep.subr.bf16.mxu0 %v1786_v20 }
  0x47   : > { %1609 = vmatpush3.bf16.msra.mxu1 %v1779_v12 }
  0x48   : > { %1610 = vmatprep.subr.bf16.mxu1 %v1780_v14 }
  0x49   : > { %1639 = vmatpush3.bf16.msra.mxu0 %v1786_v20 }
  0x4a   : > { %1640 = vmatprep.subr.bf16.mxu0 %v1787_v21 }
  0x4b   : > { %1611 = vmatpush3.bf16.msra.mxu1 %v1780_v14 }
  0x4c   : > { %1593 = vmatmul.mubr.msk.bf16.gmra.mrb[8].mxu0 %vm419_vm0, %v1772_v10  ;;  %1612 = vmatprep.subr.bf16.mxu1 %v1781_v15 }
  0x4d   : > { %1596 = vmatprep.mubr.msk.bf16.mxu0 %vm419_vm0, %v1773_v11  ;;  %1641 = vmatpush3.bf16.msra.mxu0 %v1787_v21 }
  0x4e   : > { %1642 = vmatprep.subr.bf16.mxu0 %v1788_v22 }
  0x4f   : > { %1613 = vmatpush3.bf16.msra.mxu1 %v1781_v15 }
  0x50   : > { %1614 = vmatprep.subr.bf16.mxu1 %v1782_v16 }
  0x51   : > { %1643 = vmatpush3.bf16.msra.mxu0 %v1788_v22 }
  0x53   : > { %1615 = vmatpush3.bf16.msra.mxu1 %v1782_v16 }
  0x54   : > { %1597 = vmatmul.mubr.msk.bf16.gmra.mrb[12].mxu0 %vm419_vm0, %v1774_v13 }
 0x10f   : > { %v1586_v30 = vpop.f32.mrb[0].mxu0 }
 0x110   : > { %v487_v31 = vadd.f32 %v1586_v30, %v2109_v28  ;;  %v478_v32 = vpop.f32.mrb[1].mxu0 }
 0x111   : > { %v479_v33 = vadd.f32 %v478_v32, %v2109_v28  ;;  %v1587_v34 = vpop.f32.mrb[2].mxu0 }
 0x112   : > { %v563_v35 = vmul.f32 %v2112_v29, %v487_v31  ;;  %v490_v36 = vadd.f32 %v1587_v34, %v2109_v28  ;;  %v481_v37 = vpop.f32.mrb[3].mxu0  ;;  %vm543_vm1 = vcmp.gt.f32.partialorder %v487_v31, 0.0 }
 0x113   : > { %v561_v38 = vmul.f32 %v2112_v29, %v479_v33  ;;  %v482_v39 = vadd.f32 %v481_v37, %v2109_v28  ;;  %vm541_vm3 = vcmp.gt.f32.partialorder %v479_v33, 0.0 }
 0x114   : > { %vm544_vm2 = vcmp.gt.f32.partialorder %v490_v36, 0.0  ;;  %v564_v40 = vmul.f32 %v2112_v29, %v490_v36  ;;  %v579_v42 = vsel %vm543_vm1, %v487_v31, %v563_v35 }
 0x115   : > { %v562_v41 = vmul.f32 %v2112_v29, %v482_v39  ;;  %vm542_vm4 = vcmp.gt.f32.partialorder %v482_v39, 0.0  ;;  %v577_v45 = vsel %vm541_vm3, %v479_v33, %v561_v38 }
 0x116   : > { %v580_v43 = vsel %vm544_vm2, %v490_v36, %v564_v40 }
 0x117   : > { %v1590_v44 = vpop.f32.mrb[4].mxu0  ;;  %v578_v46 = vsel %vm542_vm4, %v482_v39, %v562_v41  ;;  %v594_v47 = vpack.c.bf16 %v580_v43, %v579_v42  ;;  %v1790_v42 = vld [vmem:[%s2331_s5 + $0x38] sm:$0xff]   ;;  %v2152_v43 = vld [vmem:[#allocation2 + $0x8] sm:$0xff]  }
 0x118   : > { %v503_v48 = vadd.f32 %v1590_v44, %v2109_v28  ;;  %v494_v49 = vpop.f32.mrb[5].mxu0  ;;  %v593_v50 = vpack.c.bf16 %v578_v46, %v577_v45  ;;  %v2155_v44 = vld [vmem:[#allocation2 + $0x10] sm:$0xff]   ;;  %v2159_v45 = vld [vmem:[#allocation2 + $0x18] sm:$0xff]   ;;  %v2163_v46 = vld [vmem:[#allocation2 + $0x20] sm:$0xff]  }
 0x119   : > { %v495_v51 = vadd.f32 %v494_v49, %v2109_v28  ;;  %v1591_v52 = vpop.f32.mrb[6].mxu0 }
 0x11a   : > { %v567_v53 = vmul.f32 %v2112_v29, %v503_v48  ;;  %v506_v54 = vadd.f32 %v1591_v52, %v2109_v28  ;;  %v497_v55 = vpop.f32.mrb[7].mxu0  ;;  %1616 = vmatprep.mubr.bf16.mxu1 %v593_v50  ;;  %vm547_vm5 = vcmp.gt.f32.partialorder %v503_v48, 0.0 }
 0x11b   : > { %v565_v56 = vmul.f32 %v2112_v29, %v495_v51  ;;  %v498_v57 = vadd.f32 %v497_v55, %v2109_v28  ;;  %1617 = vmatmul.mubr.bf16.vlgmr.msra.gmra.mrb[0].mxu1 %v594_v47  ;;  %vm545_vm6 = vcmp.gt.f32.partialorder %v495_v51, 0.0  ;;  %v617_v47 = vld [vmem:[%s2330_s4] sm:$0x3] }
 0x11c   : > { %vm548_vm7 = vcmp.gt.f32.partialorder %v506_v54, 0.0  ;;  %v568_v58 = vmul.f32 %v2112_v29, %v506_v54  ;;  %v583_v60 = vsel %vm547_vm5, %v503_v48, %v567_v53  ;;  %v2172_v48 = vrot.slane %v617_v47, %v2101_v25 }
 0x11d   : > { %vm546_vm8 = vcmp.gt.f32.partialorder %v498_v57, 0.0  ;;  %v566_v59 = vmul.f32 %v2112_v29, %v498_v57  ;;  %v581_v63 = vsel %vm545_vm6, %v495_v51, %v565_v56  ;;  %v2175_v49 = vrot.slane %v617_v47, %v2106_v27 }
 0x11e   : > { %v584_v61 = vsel %vm548_vm7, %v506_v54, %v568_v58 }
 0x11f   : > { %v1594_v62 = vpop.f32.mrb[8].mxu0  ;;  %v582_v0 = vsel %vm546_vm8, %v498_v57, %v566_v59  ;;  %v596_v1 = vpack.c.bf16 %v584_v61, %v583_v60 }
 0x120   : > { %v519_v2 = vadd.f32 %v1594_v62, %v2109_v28  ;;  %v510_v3 = vpop.f32.mrb[9].mxu0  ;;  %v595_v4 = vpack.c.bf16 %v582_v0, %v581_v63 }
 0x121   : > { %v511_v5 = vadd.f32 %v510_v3, %v2109_v28  ;;  %v1595_v6 = vpop.f32.mrb[10].mxu0 }
 0x122   : > { %v571_v7 = vmul.f32 %v2112_v29, %v519_v2  ;;  %v522_v8 = vadd.f32 %v1595_v6, %v2109_v28  ;;  %v513_v9 = vpop.f32.mrb[11].mxu0  ;;  %1620 = vmatprep.mubr.bf16.mxu1 %v595_v4  ;;  %vm551_vm9 = vcmp.gt.f32.partialorder %v519_v2, 0.0 }
 0x123   : > { %v569_v10 = vmul.f32 %v2112_v29, %v511_v5  ;;  %v514_v11 = vadd.f32 %v513_v9, %v2109_v28  ;;  %1621 = vmatmul.mubr.bf16.gmra.mrb[4].mxu1 %v596_v1  ;;  %vm549_vm10 = vcmp.gt.f32.partialorder %v511_v5, 0.0 }
 0x124   : > { %vm552_vm11 = vcmp.gt.f32.partialorder %v522_v8, 0.0  ;;  %v572_v12 = vmul.f32 %v2112_v29, %v522_v8  ;;  %v587_v14 = vsel %vm551_vm9, %v519_v2, %v571_v7 }
 0x125   : > { %vm550_vm12 = vcmp.gt.f32.partialorder %v514_v11, 0.0  ;;  %v570_v13 = vmul.f32 %v2112_v29, %v514_v11  ;;  %v585_v17 = vsel %vm549_vm10, %v511_v5, %v569_v10 }
 0x126   : > { %v588_v15 = vsel %vm552_vm11, %v522_v8, %v572_v12 }
 0x127   : > { %v1598_v16 = vpop.f32.mrb[12].mxu0  ;;  %v586_v18 = vsel %vm550_vm12, %v514_v11, %v570_v13  ;;  %v598_v19 = vpack.c.bf16 %v588_v15, %v587_v14 }
 0x128   : > { %v535_v20 = vadd.f32 %v1598_v16, %v2109_v28  ;;  %v526_v21 = vpop.f32.mrb[13].mxu0  ;;  %v597_v22 = vpack.c.bf16 %v586_v18, %v585_v17 }
 0x129   : > { %v527_v23 = vadd.f32 %v526_v21, %v2109_v28  ;;  %v1599_v24 = vpop.f32.mrb[14].mxu0 }
 0x12a   : > { %v575_v26 = vmul.f32 %v2112_v29, %v535_v20  ;;  %v538_v30 = vadd.f32 %v1599_v24, %v2109_v28  ;;  %v529_v31 = vpop.f32.mrb[15].mxu0  ;;  %1624 = vmatprep.mubr.bf16.mxu1 %v597_v22  ;;  %vm555_vm13 = vcmp.gt.f32.partialorder %v535_v20, 0.0 }
 0x12b   : > { %v573_v32 = vmul.f32 %v2112_v29, %v527_v23  ;;  %v530_v33 = vadd.f32 %v529_v31, %v2109_v28  ;;  %1625 = vmatmul.mubr.bf16.gmra.mrb[8].mxu1 %v598_v19  ;;  %vm553_vm14 = vcmp.gt.f32.partialorder %v527_v23, 0.0  ;;  %v1789_v28 = vld [vmem:[%s2331_s5 + $0x30] sm:$0xff]  }
 0x12c   : > { %vm556_vm15 = vcmp.gt.f32.partialorder %v538_v30, 0.0  ;;  %v576_v34 = vmul.f32 %v2112_v29, %v538_v30  ;;  %v591_v36 = vsel %vm555_vm13, %v535_v20, %v575_v26  ;;  %1644 = vmatprep.subr.bf16.mxu0 %v1789_v28 }
 0x12d   : > { %vm554_vm0 = vcmp.gt.f32.partialorder %v530_v33, 0.0  ;;  %v574_v35 = vmul.f32 %v2112_v29, %v530_v33  ;;  %v589_v38 = vsel %vm553_vm14, %v527_v23, %v573_v32  ;;  %1645 = vmatpush3.bf16.msra.mxu0 %v1789_v28  ;;  %v1791_v29 = vld [vmem:[#allocation2] sm:$0xff]  }
 0x12e   : > { %v592_v37 = vsel %vm556_vm15, %v538_v30, %v576_v34  ;;  %1646 = vmatprep.subr.bf16.mxu0 %v1790_v42  ;;  %1696 = vmatprep.subr.bf16.mxu1 %v1791_v29 }
 0x12f   : > { %v590_v39 = vsel %vm554_vm0, %v530_v33, %v574_v35  ;;  %v600_v40 = vpack.c.bf16 %v592_v37, %v591_v36  ;;  %1704 = vmatpush3.bf16.msra.mxu1 %v1791_v29 }
 0x130   : > { %v599_v41 = vpack.c.bf16 %v590_v39, %v589_v38  ;;  %1697 = vmatprep.subr.bf16.mxu1 %v2152_v43 }
 0x131   : > { %1647 = vmatpush3.bf16.msra.mxu0 %v1790_v42 }
 0x132   : > { %1628 = vmatprep.mubr.bf16.mxu1 %v599_v41  ;;  %1664 = vmatprep.subr.bf16.mxu0 %v1791_v29 }
 0x133   : > { %1629 = vmatmul.mubr.bf16.gmra.mrb[12].mxu1 %v600_v40 }
 0x134   : > { %1705 = vmatpush3.bf16.msra.mxu1 %v2152_v43 }
 0x135   : > { %1698 = vmatprep.subr.bf16.mxu1 %v2155_v44 }
 0x138   : > { %1706 = vmatpush3.bf16.msra.mxu1 %v2155_v44 }
 0x139   : > { %1699 = vmatprep.subr.bf16.mxu1 %v2159_v45 }
 0x13c   : > { %1707 = vmatpush3.bf16.msra.mxu1 %v2159_v45 }
 0x13d   : > { %1700 = vmatprep.subr.bf16.mxu1 %v2163_v46 }
 0x140   : > { %1708 = vmatpush3.bf16.msra.mxu1 %v2163_v46 }
 0x1ee   : > { %v1618_v50 = vpop.f32.mrb[0].mxu1 }
 0x1ef   : > { %v713_v51 = vadd.f32 %v1618_v50, %v2172_v48  ;;  %v704_v52 = vpop.f32.mrb[1].mxu1 }
 0x1f0   : > { %v705_v53 = vadd.f32 %v704_v52, %v2172_v48  ;;  %v1619_v54 = vpop.f32.mrb[2].mxu1 }
 0x1f1   : > { %v789_v55 = vmul.f32 %v2175_v49, %v713_v51  ;;  %v716_v56 = vadd.f32 %v1619_v54, %v2172_v48  ;;  %v707_v57 = vpop.f32.mrb[3].mxu1  ;;  %vm769_vm1 = vcmp.gt.f32.partialorder %v713_v51, 0.0 }
 0x1f2   : > { %v787_v58 = vmul.f32 %v2175_v49, %v705_v53  ;;  %v708_v59 = vadd.f32 %v707_v57, %v2172_v48  ;;  %vm767_vm2 = vcmp.gt.f32.partialorder %v705_v53, 0.0 }
 0x1f3   : > { %vm770_vm3 = vcmp.gt.f32.partialorder %v716_v56, 0.0  ;;  %v790_v60 = vmul.f32 %v2175_v49, %v716_v56  ;;  %v805_v62 = vsel %vm769_vm1, %v713_v51, %v789_v55 }
 0x1f4   : > { %vm768_vm4 = vcmp.gt.f32.partialorder %v708_v59, 0.0  ;;  %v788_v61 = vmul.f32 %v2175_v49, %v708_v59  ;;  %v803_v2 = vsel %vm767_vm2, %v705_v53, %v787_v58 }
 0x1f5   : > { %v806_v63 = vsel %vm770_vm3, %v716_v56, %v790_v60 }
 0x1f6   : > { %v820_v0 = vpack.c.bf16 %v806_v63, %v805_v62  ;;  %v1622_v1 = vpop.f32.mrb[4].mxu1  ;;  %v804_v3 = vsel %vm768_vm4, %v708_v59, %v788_v61  ;;  %v1796_v63 = vld [vmem:[#allocation2 + $0x28] sm:$0xff]  }
 0x1f7   : > { %v729_v4 = vadd.f32 %v1622_v1, %v2172_v48  ;;  %v720_v5 = vpop.f32.mrb[5].mxu1  ;;  %v819_v6 = vpack.c.bf16 %v804_v3, %v803_v2  ;;  %1701 = vmatprep.subr.bf16.mxu1 %v1796_v63 }
 0x1f8   : > { %v721_v7 = vadd.f32 %v720_v5, %v2172_v48  ;;  %v1623_v8 = vpop.f32.mrb[6].mxu1  ;;  %1709 = vmatpush3.bf16.msra.mxu1 %v1796_v63 }
 0x1f9   : > { %v793_v9 = vmul.f32 %v2175_v49, %v729_v4  ;;  %v732_v10 = vadd.f32 %v1623_v8, %v2172_v48  ;;  %v723_v11 = vpop.f32.mrb[7].mxu1  ;;  %1648 = vmatprep.mubr.bf16.mxu0 %v819_v6  ;;  %vm773_vm5 = vcmp.gt.f32.partialorder %v729_v4, 0.0 }
 0x1fa   : > { %v791_v12 = vmul.f32 %v2175_v49, %v721_v7  ;;  %v724_v13 = vadd.f32 %v723_v11, %v2172_v48  ;;  %1649 = vmatmul.mubr.bf16.vlgmr.msra.gmra.mrb[16].mxu0 %v820_v0  ;;  %vm771_vm6 = vcmp.gt.f32.partialorder %v721_v7, 0.0 }
 0x1fb   : > { %vm774_vm7 = vcmp.gt.f32.partialorder %v732_v10, 0.0  ;;  %v794_v14 = vmul.f32 %v2175_v49, %v732_v10  ;;  %1665 = vmatpush3.bf16.msra.mxu0 %v1791_v29  ;;  %v809_v16 = vsel %vm773_vm5, %v729_v4, %v793_v9 }
 0x1fc   : > { %vm772_vm8 = vcmp.gt.f32.partialorder %v724_v13, 0.0  ;;  %v792_v15 = vmul.f32 %v2175_v49, %v724_v13  ;;  %1666 = vmatprep.subr.bf16.mxu0 %v2152_v43  ;;  %v807_v19 = vsel %vm771_vm6, %v721_v7, %v791_v12 }
 0x1fd   : > { %v810_v17 = vsel %vm774_vm7, %v732_v10, %v794_v14 }
 0x1fe   : > { %v1626_v18 = vpop.f32.mrb[8].mxu1  ;;  %v808_v20 = vsel %vm772_vm8, %v724_v13, %v792_v15  ;;  %v822_v21 = vpack.c.bf16 %v810_v17, %v809_v16 }
 0x1ff   : > { %v745_v22 = vadd.f32 %v1626_v18, %v2172_v48  ;;  %v736_v23 = vpop.f32.mrb[9].mxu1  ;;  %v821_v24 = vpack.c.bf16 %v808_v20, %v807_v19  ;;  %1667 = vmatpush3.bf16.msra.mxu0 %v2152_v43 }
 0x200   : > { %v737_v26 = vadd.f32 %v736_v23, %v2172_v48  ;;  %v1627_v30 = vpop.f32.mrb[10].mxu1  ;;  %1668 = vmatprep.subr.bf16.mxu0 %v2155_v44 }
 0x201   : > { %v797_v31 = vmul.f32 %v2175_v49, %v745_v22  ;;  %v748_v32 = vadd.f32 %v1627_v30, %v2172_v48  ;;  %v739_v33 = vpop.f32.mrb[11].mxu1  ;;  %1652 = vmatprep.mubr.bf16.mxu0 %v821_v24  ;;  %vm777_vm9 = vcmp.gt.f32.partialorder %v745_v22, 0.0 }
 0x202   : > { %v795_v34 = vmul.f32 %v2175_v49, %v737_v26  ;;  %v740_v35 = vadd.f32 %v739_v33, %v2172_v48  ;;  %1653 = vmatmul.mubr.bf16.gmra.mrb[20].mxu0 %v822_v21  ;;  %vm775_vm10 = vcmp.gt.f32.partialorder %v737_v26, 0.0 }
 0x203   : > { %vm778_vm11 = vcmp.gt.f32.partialorder %v748_v32, 0.0  ;;  %v798_v36 = vmul.f32 %v2175_v49, %v748_v32  ;;  %1669 = vmatpush3.bf16.msra.mxu0 %v2155_v44  ;;  %v813_v38 = vsel %vm777_vm9, %v745_v22, %v797_v31 }
 0x204   : > { %vm776_vm12 = vcmp.gt.f32.partialorder %v740_v35, 0.0  ;;  %v796_v37 = vmul.f32 %v2175_v49, %v740_v35  ;;  %1670 = vmatprep.subr.bf16.mxu0 %v2159_v45  ;;  %v811_v41 = vsel %vm775_vm10, %v737_v26, %v795_v34 }
 0x205   : > { %v814_v39 = vsel %vm778_vm11, %v748_v32, %v798_v36 }
 0x206   : > { %v1630_v40 = vpop.f32.mrb[12].mxu1  ;;  %v812_v28 = vsel %vm776_vm12, %v740_v35, %v796_v37  ;;  %v824_v42 = vpack.c.bf16 %v814_v39, %v813_v38 }
 0x207   : > { %v761_v29 = vadd.f32 %v1630_v40, %v2172_v48  ;;  %v752_v43 = vpop.f32.mrb[13].mxu1  ;;  %v823_v47 = vpack.c.bf16 %v812_v28, %v811_v41  ;;  %1671 = vmatpush3.bf16.msra.mxu0 %v2159_v45 }
 0x208   : > { %v753_v50 = vadd.f32 %v752_v43, %v2172_v48  ;;  %v1631_v44 = vpop.f32.mrb[14].mxu1  ;;  %1672 = vmatprep.subr.bf16.mxu0 %v2163_v46 }
 0x209   : > { %v801_v51 = vmul.f32 %v2175_v49, %v761_v29  ;;  %v764_v52 = vadd.f32 %v1631_v44, %v2172_v48  ;;  %v755_v53 = vpop.f32.mrb[15].mxu1  ;;  %1656 = vmatprep.mubr.bf16.mxu0 %v823_v47  ;;  %vm781_vm13 = vcmp.gt.f32.partialorder %v761_v29, 0.0 }
 0x20a   : > { %v799_v54 = vmul.f32 %v2175_v49, %v753_v50  ;;  %v756_v55 = vadd.f32 %v755_v53, %v2172_v48  ;;  %1657 = vmatmul.mubr.bf16.gmra.mrb[24].mxu0 %v824_v42  ;;  %vm779_vm14 = vcmp.gt.f32.partialorder %v753_v50, 0.0  ;;  %v1797_v48 = vld [vmem:[#allocation2 + $0x30] sm:$0xff]  }
 0x20b   : > { %vm782_vm15 = vcmp.gt.f32.partialorder %v764_v52, 0.0  ;;  %v802_v45 = vmul.f32 %v2175_v49, %v764_v52  ;;  %1673 = vmatpush3.bf16.msra.mxu0 %v2163_v46  ;;  %v817_v57 = vsel %vm781_vm13, %v761_v29, %v801_v51  ;;  %1702 = vmatprep.subr.bf16.mxu1 %v1797_v48  ;;  %v1798_v46 = vld [vmem:[#allocation2 + $0x38] sm:$0xff]  }
 0x20c   : > { %vm780_vm0 = vcmp.gt.f32.partialorder %v756_v55, 0.0  ;;  %v800_v56 = vmul.f32 %v2175_v49, %v756_v55  ;;  %v815_v59 = vsel %vm779_vm14, %v753_v50, %v799_v54  ;;  %1674 = vmatprep.subr.bf16.mxu0 %v1796_v63  ;;  %1710 = vmatpush3.bf16.msra.mxu1 %v1797_v48  ;;  %v843_v49 = vld [vmem:[%s2332_s6] sm:$0x3] }
 0x20d   : > { %v818_v58 = vsel %vm782_vm15, %v764_v52, %v802_v45  ;;  %1703 = vmatprep.subr.bf16.mxu1 %v1798_v46  ;;  %v2221_v0 = vrot.slane %v843_v49, %v2101_v25  ;;  %v2224_v1 = vrot.slane %v843_v49, %v2106_v27 }
 0x20e   : > { %v816_v60 = vsel %vm780_vm0, %v756_v55, %v800_v56  ;;  %v826_v61 = vpack.c.bf16 %v818_v58, %v817_v57 }
 0x20f   : > { %v825_v62 = vpack.c.bf16 %v816_v60, %v815_v59  ;;  %1675 = vmatpush3.bf16.msra.mxu0 %v1796_v63 }
 0x210   : > { %1676 = vmatprep.subr.bf16.mxu0 %v1797_v48  ;;  %1711 = vmatpush3.bf16.msra.mxu1 %v1798_v46 }
 0x211   : > { %1660 = vmatprep.mubr.bf16.mxu0 %v825_v62 }
 0x212   : > { %1661 = vmatmul.mubr.bf16.gmra.mrb[28].mxu0 %v826_v61 }
 0x213   : > { %1677 = vmatpush3.bf16.msra.mxu0 %v1797_v48 }
 0x214   : > { %1678 = vmatprep.subr.bf16.mxu0 %v1798_v46 }
 0x217   : > { %1679 = vmatpush3.bf16.msra.mxu0 %v1798_v46 }
 0x2cd   : > { %v1650_v2 = vpop.f32.mrb[16].mxu0 }
 0x2ce   : > { %v939_v3 = vadd.f32 %v1650_v2, %v2221_v0  ;;  %v930_v4 = vpop.f32.mrb[17].mxu0 }
 0x2cf   : > { %v931_v5 = vadd.f32 %v930_v4, %v2221_v0  ;;  %v1651_v6 = vpop.f32.mrb[18].mxu0 }
 0x2d0   : > { %v1015_v7 = vmul.f32 %v2224_v1, %v939_v3  ;;  %v942_v8 = vadd.f32 %v1651_v6, %v2221_v0  ;;  %v933_v9 = vpop.f32.mrb[19].mxu0  ;;  %vm995_vm1 = vcmp.gt.f32.partialorder %v939_v3, 0.0 }
 0x2d1   : > { %v1013_v10 = vmul.f32 %v2224_v1, %v931_v5  ;;  %v934_v25 = vadd.f32 %v933_v9, %v2221_v0  ;;  %vm993_vm2 = vcmp.gt.f32.partialorder %v931_v5, 0.0 }
 0x2d2   : > { %vm996_vm3 = vcmp.gt.f32.partialorder %v942_v8, 0.0  ;;  %v1016_v27 = vmul.f32 %v2224_v1, %v942_v8  ;;  %v1031_v12 = vsel %vm995_vm1, %v939_v3, %v1015_v7 }
 0x2d3   : > { %vm994_vm4 = vcmp.gt.f32.partialorder %v934_v25, 0.0  ;;  %v1014_v11 = vmul.f32 %v2224_v1, %v934_v25  ;;  %v1029_v16 = vsel %vm993_vm2, %v931_v5, %v1013_v10 }
 0x2d4   : > { %v1032_v13 = vsel %vm996_vm3, %v942_v8, %v1016_v27 }
 0x2d5   : > { %v1046_v14 = vpack.c.bf16 %v1032_v13, %v1031_v12  ;;  %v1654_v15 = vpop.f32.mrb[20].mxu0  ;;  %v1030_v17 = vsel %vm994_vm4, %v934_v25, %v1014_v11 }
 0x2d6   : > { %v955_v18 = vadd.f32 %v1654_v15, %v2221_v0  ;;  %v946_v19 = vpop.f32.mrb[21].mxu0  ;;  %v1045_v20 = vpack.c.bf16 %v1030_v17, %v1029_v16 }
 0x2d7   : > { %v947_v21 = vadd.f32 %v946_v19, %v2221_v0  ;;  %v1655_v22 = vpop.f32.mrb[22].mxu0 }
 0x2d8   : > { %v1019_v23 = vmul.f32 %v2224_v1, %v955_v18  ;;  %v958_v24 = vadd.f32 %v1655_v22, %v2221_v0  ;;  %v949_v26 = vpop.f32.mrb[23].mxu0  ;;  %1680 = vmatprep.mubr.bf16.mxu0 %v1045_v20  ;;  %vm999_vm5 = vcmp.gt.f32.partialorder %v955_v18, 0.0 }
 0x2d9   : > { %v1017_v30 = vmul.f32 %v2224_v1, %v947_v21  ;;  %v950_v31 = vadd.f32 %v949_v26, %v2221_v0  ;;  %1681 = vmatmul.mubr.bf16.vlgmr.msra.gmra.mrb[32].mxu0 %v1046_v14  ;;  %vm997_vm6 = vcmp.gt.f32.partialorder %v947_v21, 0.0 }
 0x2da   : > { %vm1000_vm7 = vcmp.gt.f32.partialorder %v958_v24, 0.0  ;;  %v1020_v32 = vmul.f32 %v2224_v1, %v958_v24  ;;  %v1035_v34 = vsel %vm999_vm5, %v955_v18, %v1019_v23 }
 0x2db   : > { %vm998_vm8 = vcmp.gt.f32.partialorder %v950_v31, 0.0  ;;  %v1018_v33 = vmul.f32 %v2224_v1, %v950_v31  ;;  %v1033_v38 = vsel %vm997_vm6, %v947_v21, %v1017_v30 }
 0x2dc   : > { %v1036_v35 = vsel %vm1000_vm7, %v958_v24, %v1020_v32 }
 0x2dd   : > { %v1048_v36 = vpack.c.bf16 %v1036_v35, %v1035_v34  ;;  %v1658_v37 = vpop.f32.mrb[24].mxu0  ;;  %v1034_v39 = vsel %vm998_vm8, %v950_v31, %v1018_v33 }
 0x2de   : > { %v971_v40 = vadd.f32 %v1658_v37, %v2221_v0  ;;  %v962_v41 = vpop.f32.mrb[25].mxu0  ;;  %v1047_v28 = vpack.c.bf16 %v1034_v39, %v1033_v38 }
 0x2df   : > { %v963_v42 = vadd.f32 %v962_v41, %v2221_v0  ;;  %v1659_v29 = vpop.f32.mrb[26].mxu0 }
 0x2e0   : > { %v1023_v43 = vmul.f32 %v2224_v1, %v971_v40  ;;  %v974_v47 = vadd.f32 %v1659_v29, %v2221_v0  ;;  %v965_v50 = vpop.f32.mrb[27].mxu0  ;;  %1684 = vmatprep.mubr.bf16.mxu1 %v1047_v28  ;;  %vm1003_vm9 = vcmp.gt.f32.partialorder %v971_v40, 0.0 }
 0x2e1   : > { %v1021_v44 = vmul.f32 %v2224_v1, %v963_v42  ;;  %v966_v51 = vadd.f32 %v965_v50, %v2221_v0  ;;  %1685 = vmatmul.mubr.bf16.vlgmr.msra.gmra.mrb[16].mxu1 %v1048_v36  ;;  %vm1001_vm10 = vcmp.gt.f32.partialorder %v963_v42, 0.0 }
 0x2e2   : > { %vm1004_vm11 = vcmp.gt.f32.partialorder %v974_v47, 0.0  ;;  %v1024_v52 = vmul.f32 %v2224_v1, %v974_v47  ;;  %v1039_v54 = vsel %vm1003_vm9, %v971_v40, %v1023_v43 }
 0x2e3   : > { %vm1002_vm12 = vcmp.gt.f32.partialorder %v966_v51, 0.0  ;;  %v1022_v53 = vmul.f32 %v2224_v1, %v966_v51  ;;  %v1037_v56 = vsel %vm1001_vm10, %v963_v42, %v1021_v44 }
 0x2e4   : > { %v1040_v55 = vsel %vm1004_vm11, %v974_v47, %v1024_v52 }
 0x2e5   : > { %v1662_v45 = vpop.f32.mrb[28].mxu0  ;;  %v1038_v57 = vsel %vm1002_vm12, %v966_v51, %v1022_v53  ;;  %v1050_v58 = vpack.c.bf16 %v1040_v55, %v1039_v54 }
 0x2e6   : > { %v987_v59 = vadd.f32 %v1662_v45, %v2221_v0  ;;  %v978_v60 = vpop.f32.mrb[29].mxu0  ;;  %v1049_v61 = vpack.c.bf16 %v1038_v57, %v1037_v56 }
 0x2e7   : > { %v979_v62 = vadd.f32 %v978_v60, %v2221_v0  ;;  %v1663_v63 = vpop.f32.mrb[30].mxu0 }
 0x2e8   : > { %v1027_v48 = vmul.f32 %v2224_v1, %v987_v59  ;;  %v990_v46 = vadd.f32 %v1663_v63, %v2221_v0  ;;  %v981_v49 = vpop.f32.mrb[31].mxu0  ;;  %1688 = vmatprep.mubr.bf16.mxu1 %v1049_v61  ;;  %vm1007_vm13 = vcmp.gt.f32.partialorder %v987_v59, 0.0 }
 0x2e9   : > { %v1025_v2 = vmul.f32 %v2224_v1, %v979_v62  ;;  %v982_v3 = vadd.f32 %v981_v49, %v2221_v0  ;;  %1689 = vmatmul.mubr.bf16.gmra.mrb[20].mxu1 %v1050_v58  ;;  %vm1005_vm14 = vcmp.gt.f32.partialorder %v979_v62, 0.0  ;;  %v1431_v0 = vld [vmem:[%s2334_s8] ss:$0 sm:$0xff] }
 0x2ea   : > { %vm1008_vm15 = vcmp.gt.f32.partialorder %v990_v46, 0.0  ;;  %v1028_v4 = vmul.f32 %v2224_v1, %v990_v46  ;;  %v1043_v6 = vsel %vm1007_vm13, %v987_v59, %v1027_v48 }
 0x2eb   : > { %vm1006_vm0 = vcmp.gt.f32.partialorder %v982_v3, 0.0  ;;  %v1026_v5 = vmul.f32 %v2224_v1, %v982_v3  ;;  %v1041_v8 = vsel %vm1005_vm14, %v979_v62, %v1025_v2 }
 0x2ec   : > { %v1044_v7 = vsel %vm1008_vm15, %v990_v46, %v1028_v4 }
 0x2ed   : > { %v1042_v9 = vsel %vm1006_vm0, %v982_v3, %v1026_v5  ;;  %v1052_v10 = vpack.c.bf16 %v1044_v7, %v1043_v6 }
 0x2ee   : > { %v1051_v25 = vpack.c.bf16 %v1042_v9, %v1041_v8 }
 0x2f0   : > { %1692 = vmatprep.mubr.bf16.mxu1 %v1051_v25 }
 0x2f1   : > { %1693 = vmatmul.mubr.bf16.gmra.mrb[24].mxu1 %v1052_v10 }
 0x3ac   : > { %v1682_v27 = vpop.f32.mrb[32].mxu0 }
 0x3ad   : > { %v1158_v11 = vpop.f32.mrb[33].mxu0  ;;  %v1167_v13 = vadd.f32 %v1682_v27, %v1431_v0 }
 0x3ae   : > { %v1683_v12 = vpop.f32.mrb[34].mxu0  ;;  %v1159_v15 = vadd.f32 %v1431_v0, %v1158_v11 }
 0x3af   : > { %v1170_v1 = vadd.f32 %v1683_v12, %v1431_v0  ;;  %v1161_v14 = vpop.f32.mrb[35].mxu0 }
 0x3b0   : > { %v1162_v16 = vadd.f32 %v1431_v0, %v1161_v14 }
 0x3b1   : > { %v1486_v17 = vpack.c.bf16 %v1170_v1, %v1167_v13 }
 0x3b2   : > { %v1481_v18 = vpack.c.bf16 %v1162_v16, %v1159_v15 }
 0x3b3   : > { %1518 = vst [vmem:[%s2264_s29 + $0x8] sm:$0xff] %v1486_v17  }
 0x3b4   : > { %1482 = vst [vmem:[%s2264_s29] sm:$0xff] %v1481_v18   ;;  %v1686_v19 = vpop.f32.mrb[16].mxu1 }
 0x3b5   : > { %v1174_v20 = vpop.f32.mrb[17].mxu1  ;;  %v1183_v22 = vadd.f32 %v1686_v19, %v1431_v0 }
 0x3b6   : > { %v1687_v21 = vpop.f32.mrb[18].mxu1  ;;  %v1175_v26 = vadd.f32 %v1431_v0, %v1174_v20 }
 0x3b7   : > { %v1186_v23 = vadd.f32 %v1687_v21, %v1431_v0  ;;  %v1177_v24 = vpop.f32.mrb[19].mxu1 }
 0x3b8   : > { %v1178_v30 = vadd.f32 %v1431_v0, %v1177_v24 }
 0x3b9   : > { %v1496_v31 = vpack.c.bf16 %v1186_v23, %v1183_v22 }
 0x3ba   : > { %v1491_v32 = vpack.c.bf16 %v1178_v30, %v1175_v26 }
 0x3bb   : > { %1520 = vst [vmem:[%s2264_s29 + $0x18] sm:$0xff] %v1496_v31  }
 0x3bc   : > { %1519 = vst [vmem:[%s2264_s29 + $0x10] sm:$0xff] %v1491_v32   ;;  %v1690_v33 = vpop.f32.mrb[20].mxu1 }
 0x3bd   : > { %v1190_v34 = vpop.f32.mrb[21].mxu1  ;;  %v1199_v36 = vadd.f32 %v1690_v33, %v1431_v0 }
 0x3be   : > { %v1691_v35 = vpop.f32.mrb[22].mxu1  ;;  %v1191_v39 = vadd.f32 %v1431_v0, %v1190_v34 }
 0x3bf   : > { %v1202_v37 = vadd.f32 %v1691_v35, %v1431_v0  ;;  %v1193_v38 = vpop.f32.mrb[23].mxu1 }
 0x3c0   : > { %v1194_v40 = vadd.f32 %v1431_v0, %v1193_v38 }
 0x3c1   : > { %v1506_v41 = vpack.c.bf16 %v1202_v37, %v1199_v36 }
 0x3c2   : > { %v1501_v28 = vpack.c.bf16 %v1194_v40, %v1191_v39 }
 0x3c3   : > { %1522 = vst [vmem:[%s2264_s29 + $0x28] sm:$0xff] %v1506_v41  }
 0x3c4   : > { %1521 = vst [vmem:[%s2264_s29 + $0x20] sm:$0xff] %v1501_v28   ;;  %v1694_v42 = vpop.f32.mrb[24].mxu1 }
 0x3c5   : > { %v1206_v29 = vpop.f32.mrb[25].mxu1  ;;  %v1215_v47 = vadd.f32 %v1694_v42, %v1431_v0 }
 0x3c6   : > { %v1695_v43 = vpop.f32.mrb[26].mxu1  ;;  %v1207_v51 = vadd.f32 %v1431_v0, %v1206_v29 }
 0x3c7   : > { %v1218_v50 = vadd.f32 %v1695_v43, %v1431_v0  ;;  %v1209_v44 = vpop.f32.mrb[27].mxu1 }
 0x3c8   : > { %v1210_v52 = vadd.f32 %v1431_v0, %v1209_v44 }
 0x3c9   : > { %v1516_v53 = vpack.c.bf16 %v1218_v50, %v1215_v47 }
 0x3ca   : > { %v1511_v54 = vpack.c.bf16 %v1210_v52, %v1207_v51 }
 0x3cb   : > { %1524 = vst [vmem:[%s2264_s29 + $0x38] sm:$0xff] %v1516_v53  }
 0x3cc   : > { %1523 = vst [vmem:[%s2264_s29 + $0x30] sm:$0xff] %v1511_v54  }
 0x3cd   : > { %1840 = shalt.err (!%p1837_p7)
}
 0x3ce   : > { %s1841_s26 = scalar_lea.hbm %s2279_s21, 1024  ;;  %s1845_s24 = scalar_lea.hbm %s2335_s9, 2048 }
 0x3cf   : > { %p1842_p8 = scmp.ne.s32.totalorder %s2279_s21, %s1841_s26  ;;  %p1846_p1 = scmp.lt.u32.totalorder %s2279_s21, %s2335_s9 }
 0x3d0   : > { %p1847_p0 = scmp.lt.u32.totalorder %s1845_s24, %s1841_s26  ;;  %p1849_p6 = scmp.lt.u32.totalorder %s1841_s26, %s2279_s21 }
 0x3d1   : > { %p1843_p11 = pnand %p1842_p8, %p2346_p9 }
 0x3d2   : > { %p1848_p5 = por %p1847_p0, %p1846_p1 }
 0x3d3   : > { %p1844_p13 = pneg %p1843_p11 }
 0x3d4   : > { %p1850_p10 = por %p1849_p6, %p1848_p5 }
 0x3d6   : > { %p1851_p12 = pnand %p1850_p10, %p1844_p13 }
 0x3d8   : > { %1854 = shalt.err (!%p1851_p12)
}
 0x3d9   : > { %s1899_s22 = smov 64   ;;  %s1900_s25 = smov 4  }
 0x3da   : > { %1716 = dma.vmem_to_hbm [thread:$0]  (%p2346_p9), %s2274_s14, 1024, %s2279_s21, %s2285_s13, %s1899_s22, %s1899_s22, %s1900_s25  }
 0x3db PF: > { %p1728_p2 = scmp.ge.s32.totalorder %s1893_s12, 2  ;;  %s1330_s28 = sand.u32 1, %s1881_s30  }
 0x3dc   : > { %p2347_p3 = scmp.ne.s32.totalorder %s2340_s20, 0  ;;  %s1331_s16 = scalar_lea.sflag [#allocation4], %s1330_s28 }
 0x3de   : > { %p1723_p4 = pnand %p1728_p2, %p2347_p3 }
 0x3e0   : > { %1876 = dma.done.wait (!%p1723_p4), %s1331_s16, 1024  }
 0x3e1   : > { %1878 = vsyncadd (!%p1723_p4), %s1331_s16, 4294966272  ;;  %p20_p7 = scmp.ge.s32.totalorder %s1976_s15, 4   ;;  %s2348_s30 = smov %s1885_s10 }
 0x3e2   : > { %s2349_s10 = smov %s1889_s11  ;;  %s2350_s11 = smov %s1987_s18 }
 0x3e3   : > { %s2351_s12 = smov %s1976_s15  ;;  %22 = sbr.rel (!%p20_p7) target bundleno = 4 (0x4), region = 96 }
 0x3ea   :  { %1336 = vsyncpa [#allocation3], 1 }
 0x3eb   :  { %1338 = vsyncpa [#allocation3 + $0x1], 1 }
 0x3ec   :  { %1339 = vsyncpa [#allocation4], 1 }
 0x3ed   :  { %1341 = vsyncpa [#allocation4 + $0x1], 1 }

</bundles_post_ra>
